<compile_context>
chip_gen: v5e
topology: v5e:2x2
jax: 0.10.0
libtpu: 0.0.40
codegen_flags: <defaults>
</compile_context>

<pallas_src>
import jax
import jax.numpy as jnp
from jax import lax
from jax.experimental import pallas as pl
from jax.experimental.pallas import tpu as pltpu


# ------------------------------ Pallas kernel ------------------------------ #

def _decoder_kernel(lat_ref, w0_ref, b0_ref, w1_ref, w2_ref, w3_ref, w4_ref,
                    t1_ref, t2_ref, t3_ref, t4_ref, o_ref):
    """One grid step = one of the four layer-1 sub-pixels (g1 = ki1*2 + kj1).

    Layout: every activation is (features, R) with R = B*64 pixels on lanes.
      lat : (L, R)        latent, broadcast over the 8x8 pixels
      w0  : (L, C0, R)    per-pixel latent-linear weight (lane-aligned)
      b0  : (C0, R)       per-pixel latent-linear bias
      w1  : (C1, C0)      BN-scaled layer-1 weight slice for this sub-pixel
      w2/w3/w4            BN-scaled dense / block-diagonal stacked weights
      t*  : (F, R)        folded BN/bias shifts, pre-broadcast along lanes
    """
    f32 = jnp.float32

    # latent linear, evaluated per output pixel on the VPU:
    #   h0[c0, r] = sum_l w0[l, c0, r] * lat[l, r] + b0[c0, r]
    h0 = jnp.sum(w0_ref[...] * lat_ref[...][:, None, :], axis=0) + b0_ref[...]

    # layers 1..3: (BN-scaled W) @ h + shift, ReLU   (MXU + VPU)
    h1 = jnp.maximum(jnp.dot(w1_ref[...], h0, preferred_element_type=f32)
                     + t1_ref[...], 0.0)
    h2 = jnp.maximum(jnp.dot(w2_ref[...], h1, preferred_element_type=f32)
                     + t2_ref[...], 0.0)
    h3 = jnp.maximum(jnp.dot(w3_ref[...], h2, preferred_element_type=f32)
                     + t3_ref[...], 0.0)
    # layer 4: no BN, tanh
    o_ref[...] = jnp.tanh(jnp.dot(w4_ref[...], h3, preferred_element_type=f32)
                          + t4_ref[...]).astype(o_ref.dtype)


# --------------------------- trace-time weight prep ------------------------- #

def _fold_bn(gamma, beta, mean, var, conv_bias, eps=1e-5):
    """Fold eval-mode BatchNorm (+ preceding conv bias) into scale/shift."""
    s = gamma * lax.rsqrt(var + eps)
    return s, (conv_bias - mean) * s + beta


def _stacked_rows(w):
    """(Cin, Cout, 2, 2) torch ConvTranspose2d weight -> (4*Cout, Cin),
    rows ordered (g = ki*2 + kj, cout)."""
    cin, cout = w.shape[0], w.shape[1]
    return jnp.transpose(w, (2, 3, 1, 0)).reshape(4 * cout, cin)


# ------------------------------- forward pass ------------------------------- #

def decoder_forward(latent, params):
    f32 = jnp.float32
    B, L = latent.shape
    C0 = params["w1"].shape[0]                 # 32 channels after the linear
    P = params["w_lin"].shape[1] // C0         # 64 = 8*8 pixels
    C = params["w4"].shape[1]                  # image channels
    R = B * P                                  # pixels on the lane axis (128)
    OUTG = 64 * C                              # output rows per g1 group

    # ---- trace-time parameter preprocessing (off the runtime hot path) ----
    # latent linear, viewed per pixel (columns of w_lin are (c0, i, j)) and
    # tiled over the batch so the lane axis is (b, i, j).
    w0 = jnp.broadcast_to(params["w_lin"].reshape(L, C0, 1, P),
                          (L, C0, B, P)).reshape(L, C0, R)
    b0 = jnp.broadcast_to(params["b_lin"].reshape(C0, 1, P),
                          (C0, B, P)).reshape(C0, R)

    s1, t1 = _fold_bn(params["bn1_g"], params["bn1_b"], params["bn1_m"],
                      params["bn1_v"], params["b1"])
    s2, t2 = _fold_bn(params["bn2_g"], params["bn2_b"], params["bn2_m"],
                      params["bn2_v"], params["b2"])
    s3, t3 = _fold_bn(params["bn3_g"], params["bn3_b"], params["bn3_m"],
                      params["bn3_v"], params["b3"])

    c1 = params["w1"].shape[1]                 # 24
    c2 = params["w2"].shape[1]                 # 12
    c3 = params["w3"].shape[1]                 # 8

    # layer 1: one (c1, C0) slice per sub-pixel g1, BN scale folded into rows
    w1s = _stacked_rows(params["w1"]).reshape(4, c1, C0) * s1[None, :, None]
    # layer 2 (g1 fixed per grid step): dense (4*c2, c1), BN scale folded
    w2s = _stacked_rows(params["w2"]) * jnp.tile(s2, 4)[:, None]
    # layer 3: block-diagonal over the 4 layer-2 sub-pixels
    w3s = (jnp.kron(jnp.eye(4, dtype=f32), _stacked_rows(params["w3"]))
           * jnp.tile(s3, 16)[:, None])
    # layer 4: block-diagonal over the 16 (layer-2, layer-3) sub-pixel pairs
    w4s = jnp.kron(jnp.eye(16, dtype=f32), _stacked_rows(params["w4"]))

    # folded shifts, pre-broadcast to lane-dense (F, R)
    t1b = jnp.broadcast_to(t1[:, None], (c1, R))
    t2b = jnp.broadcast_to(jnp.tile(t2, 4)[:, None], (4 * c2, R))
    t3b = jnp.broadcast_to(jnp.tile(t3, 16)[:, None], (16 * c3, R))
    t4b = jnp.broadcast_to(jnp.tile(params["b4"], 64)[:, None], (OUTG, R))

    # latent broadcast over the 64 pixels: lat[l, b*P + p] = latent[b, l]
    lat = jnp.broadcast_to(latent.T[:, :, None], (L, B, P)).reshape(L, R)

    out = pl.pallas_call(
        _decoder_kernel,
        out_shape=jax.ShapeDtypeStruct((4 * OUTG, R), f32),
        grid_spec=pltpu.PrefetchScalarGridSpec(
            num_scalar_prefetch=0,
            grid=(4,),                                  # layer-1 sub-pixels
            in_specs=[
                pl.BlockSpec(lat.shape, lambda g: (0, 0)),
                pl.BlockSpec(w0.shape, lambda g: (0, 0, 0)),
                pl.BlockSpec(b0.shape, lambda g: (0, 0)),
                pl.BlockSpec((None,) + w1s.shape[1:], lambda g: (g, 0, 0)),
                pl.BlockSpec(w2s.shape, lambda g: (0, 0)),
                pl.BlockSpec(w3s.shape, lambda g: (0, 0)),
                pl.BlockSpec(w4s.shape, lambda g: (0, 0)),
                pl.BlockSpec(t1b.shape, lambda g: (0, 0)),
                pl.BlockSpec(t2b.shape, lambda g: (0, 0)),
                pl.BlockSpec(t3b.shape, lambda g: (0, 0)),
                pl.BlockSpec(t4b.shape, lambda g: (0, 0)),
            ],
            out_specs=pl.BlockSpec((OUTG, R), lambda g: (g, 0)),
        ),
        compiler_params=pltpu.CompilerParams(
            dimension_semantics=("parallel",)),
    )(lat, w0, b0, w1s, w2s, w3s, w4s, t1b, t2b, t3b, t4b)

    # Un-shuffle: rows = (ki1,kj1,ki2,kj2,ki3,kj3,ki4,kj4,c), columns = (b,i,j).
    o = out.reshape(2, 2, 2, 2, 2, 2, 2, 2, C, B, 8, 8)
    o = o.transpose(9, 8, 10, 0, 2, 4, 6, 11, 1, 3, 5, 7)
    return o.reshape(B, C, 128, 128)            # NCHW, same as PyTorch


# ---------------------------- pure-JAX reference ---------------------------- #

def _convT_ref(x_nhwc, w, b):
    """PyTorch ConvTranspose2d(kernel=2, stride=2) in NHWC, pure JAX."""
    y = jnp.einsum("bhwi,iokl->bhwokl", x_nhwc, w,
                   precision=lax.Precision.HIGHEST)
    B, H, W = x_nhwc.shape[:3]
    Co = w.shape[1]
    y = y.transpose(0, 1, 4, 2, 5, 3).reshape(B, 2 * H, 2 * W, Co)
    return y + b


def decoder_reference(latent, p, eps=1e-5):
    """Pure-JAX reference (eval-mode BatchNorm), output NCHW."""
    B = latent.shape[0]
    h = jnp.dot(latent, p["w_lin"], precision=lax.Precision.HIGHEST) + p["b_lin"]
    h = h.reshape(B, 32, 8, 8).transpose(0, 2, 3, 1)     # NCHW view -> NHWC
    for i in (1, 2, 3):
        h = _convT_ref(h, p[f"w{i}"], p[f"b{i}"])
        s = p[f"bn{i}_g"] * lax.rsqrt(p[f"bn{i}_v"] + eps)
        h = jnp.maximum((h - p[f"bn{i}_m"]) * s + p[f"bn{i}_b"], 0.0)
    h = jnp.tanh(_convT_ref(h, p["w4"], p["b4"]))
    return h.transpose(0, 3, 1, 2)


# --------------------------------- params ----------------------------------- #

def init_params(key, latent_dim, img_channels):
    ks = jax.random.split(key, 16)
    conv_shape = (32, 8, 8)
    n_lin = conv_shape[0] * conv_shape[1] * conv_shape[2]

    def nrm(k, shape, scale):
        return scale * jax.random.normal(k, shape, jnp.float32)

    p = {
        "w_lin": nrm(ks[0], (latent_dim, n_lin), 0.1),
        "b_lin": nrm(ks[1], (n_lin,), 0.1),
        "w1": nrm(ks[2], (32, 24, 2, 2), 0.5), "b1": nrm(ks[3], (24,), 0.1),
        "w2": nrm(ks[4], (24, 12, 2, 2), 0.5), "b2": nrm(ks[5], (12,), 0.1),
        "w3": nrm(ks[6], (12, 8, 2, 2), 0.5),  "b3": nrm(ks[7], (8,), 0.1),
        "w4": nrm(ks[8], (8, img_channels, 2, 2), 0.5),
        "b4": nrm(ks[9], (img_channels,), 0.1),
    }
    for i, (k, c) in enumerate(zip(ks[10:13], (24, 12, 8)), start=1):
        kg, kb, km, kv = jax.random.split(k, 4)
        p[f"bn{i}_g"] = 1.0 + 0.1 * jax.random.normal(kg, (c,), jnp.float32)
        p[f"bn{i}_b"] = 0.1 * jax.random.normal(kb, (c,), jnp.float32)
        p[f"bn{i}_m"] = 0.1 * jax.random.normal(km, (c,), jnp.float32)
        p[f"bn{i}_v"] = 0.5 + jnp.abs(jax.random.normal(kv, (c,), jnp.float32))
    return p


# ----------------------------------- main ------------------------------------ #

if __name__ == "__main__":
    key = jax.random.PRNGKey(0)
    k_param, k_lat = jax.random.split(key)

    batch, latent_dim, img_channels = 2, 32, 3     # img_size[-1] = 3
    params = init_params(k_param, latent_dim, img_channels)
    latent = jax.random.normal(k_lat, (batch, latent_dim), jnp.float32)

    out = jax.block_until_ready(jax.jit(decoder_forward)(latent, params))
    assert out.shape == (batch, img_channels, 128, 128), out.shape

    ref = jax.block_until_ready(jax.jit(decoder_reference)(latent, params))
    max_err = float(jnp.max(jnp.abs(out - ref)))
    assert max_err < 3e-2, f"mismatch vs pure-JAX reference: {max_err}"
    assert bool(jnp.all(jnp.isfinite(out)))
    assert bool(jnp.all(jnp.abs(out) <= 1.0 + 1e-6))   # tanh range
    print("KERNEL_OK")
</pallas_src>

<mosaic_0001>
module attributes {stable_mosaic.version = 11 : i64} {
  func.func @_decoder_kernel(%arg0: i32, %arg1: memref<32x128xf32, #tpu.memory_space<vmem>>, %arg2: memref<32x32x128xf32, #tpu.memory_space<vmem>>, %arg3: memref<32x128xf32, #tpu.memory_space<vmem>>, %arg4: memref<1x24x32xf32, #tpu.memory_space<vmem>>, %arg5: memref<48x24xf32, #tpu.memory_space<vmem>>, %arg6: memref<128x48xf32, #tpu.memory_space<vmem>>, %arg7: memref<192x128xf32, #tpu.memory_space<vmem>>, %arg8: memref<24x128xf32, #tpu.memory_space<vmem>>, %arg9: memref<48x128xf32, #tpu.memory_space<vmem>>, %arg10: memref<128x128xf32, #tpu.memory_space<vmem>>, %arg11: memref<192x128xf32, #tpu.memory_space<vmem>>, %arg12: memref<192x128xf32, #tpu.memory_space<vmem>>) attributes {dimension_semantics = [#tpu.dimension_semantics<parallel>], iteration_bounds = array<i64: 4>, scalar_prefetch = 0 : i64, scratch_operands = 0 : i64, tpu.core_type = #tpu.core_type<tc>, window_params = [{pipeline_mode = #tpu.pipeline_mode<synchronous>, transform_indices = @transform_0, window_bounds = array<i64: 32, 128>}, {pipeline_mode = #tpu.pipeline_mode<synchronous>, transform_indices = @transform_1, window_bounds = array<i64: 32, 32, 128>}, {pipeline_mode = #tpu.pipeline_mode<synchronous>, transform_indices = @transform_2, window_bounds = array<i64: 32, 128>}, {transform_indices = @transform_3, window_bounds = array<i64: 1, 24, 32>}, {pipeline_mode = #tpu.pipeline_mode<synchronous>, transform_indices = @transform_4, window_bounds = array<i64: 48, 24>}, {pipeline_mode = #tpu.pipeline_mode<synchronous>, transform_indices = @transform_5, window_bounds = array<i64: 128, 48>}, {pipeline_mode = #tpu.pipeline_mode<synchronous>, transform_indices = @transform_6, window_bounds = array<i64: 192, 128>}, {pipeline_mode = #tpu.pipeline_mode<synchronous>, transform_indices = @transform_7, window_bounds = array<i64: 24, 128>}, {pipeline_mode = #tpu.pipeline_mode<synchronous>, transform_indices = @transform_8, window_bounds = array<i64: 48, 128>}, {pipeline_mode = #tpu.pipeline_mode<synchronous>, transform_indices = @transform_9, window_bounds = array<i64: 128, 128>}, {pipeline_mode = #tpu.pipeline_mode<synchronous>, transform_indices = @transform_10, window_bounds = array<i64: 192, 128>}, {transform_indices = @transform_11, window_bounds = array<i64: 192, 128>}]} {
    %c0 = arith.constant 0 : index
    %c0_0 = arith.constant 0 : index
    %c0_1 = arith.constant 0 : index
    %0 = vector.load %arg2[%c0, %c0_0, %c0_1] : memref<32x32x128xf32, #tpu.memory_space<vmem>>, vector<32x32x128xf32>
    %c0_2 = arith.constant 0 : index
    %c0_3 = arith.constant 0 : index
    %1 = vector.load %arg1[%c0_2, %c0_3] : memref<32x128xf32, #tpu.memory_space<vmem>>, vector<32x128xf32>
    %2 = vector.shape_cast %1 : vector<32x128xf32> to vector<32x1x128xf32>
    %3 = vector.broadcast %2 : vector<32x1x128xf32> to vector<32x32x128xf32>
    %4 = arith.mulf %0, %3 : vector<32x32x128xf32>
    %cst = arith.constant dense<0.000000e+00> : vector<32x128xf32>
    %5 = vector.multi_reduction <add>, %4, %cst [0] : vector<32x32x128xf32> to vector<32x128xf32>
    %c0_4 = arith.constant 0 : index
    %c0_5 = arith.constant 0 : index
    %6 = vector.load %arg3[%c0_4, %c0_5] : memref<32x128xf32, #tpu.memory_space<vmem>>, vector<32x128xf32>
    %7 = arith.addf %5, %6 : vector<32x128xf32>
    %c0_6 = arith.constant 0 : index
    %c0_7 = arith.constant 0 : index
    %c0_8 = arith.constant 0 : index
    %8 = vector.load %arg4[%c0_6, %c0_7, %c0_8] : memref<1x24x32xf32, #tpu.memory_space<vmem>>, vector<1x24x32xf32>
    %9 = vector.shape_cast %8 : vector<1x24x32xf32> to vector<24x32xf32>
    %cst_9 = arith.constant dense<0.000000e+00> : vector<24x128xf32>
    %10 = tpu.matmul %9, %7, %cst_9 {dimension_numbers = #tpu.dot_dimension_numbers<[1], [0], [0], [1], [0, 0, 1, 1], [], []>} : vector<24x32xf32>, vector<32x128xf32>, vector<24x128xf32> -> vector<24x128xf32>
    %c0_10 = arith.constant 0 : index
    %c0_11 = arith.constant 0 : index
    %11 = vector.load %arg8[%c0_10, %c0_11] : memref<24x128xf32, #tpu.memory_space<vmem>>, vector<24x128xf32>
    %12 = arith.addf %10, %11 : vector<24x128xf32>
    %cst_12 = arith.constant 0.000000e+00 : f32
    %13 = vector.broadcast %cst_12 : f32 to vector<24x128xf32>
    %14 = arith.maximumf %12, %13 : vector<24x128xf32>
    %c0_13 = arith.constant 0 : index
    %c0_14 = arith.constant 0 : index
    %15 = vector.load %arg5[%c0_13, %c0_14] : memref<48x24xf32, #tpu.memory_space<vmem>>, vector<48x24xf32>
    %cst_15 = arith.constant dense<0.000000e+00> : vector<48x128xf32>
    %16 = tpu.matmul %15, %14, %cst_15 {dimension_numbers = #tpu.dot_dimension_numbers<[1], [0], [0], [1], [0, 0, 1, 1], [], []>} : vector<48x24xf32>, vector<24x128xf32>, vector<48x128xf32> -> vector<48x128xf32>
    %c0_16 = arith.constant 0 : index
    %c0_17 = arith.constant 0 : index
    %17 = vector.load %arg9[%c0_16, %c0_17] : memref<48x128xf32, #tpu.memory_space<vmem>>, vector<48x128xf32>
    %18 = arith.addf %16, %17 : vector<48x128xf32>
    %cst_18 = arith.constant 0.000000e+00 : f32
    %19 = vector.broadcast %cst_18 : f32 to vector<48x128xf32>
    %20 = arith.maximumf %18, %19 : vector<48x128xf32>
    %c0_19 = arith.constant 0 : index
    %c0_20 = arith.constant 0 : index
    %21 = vector.load %arg6[%c0_19, %c0_20] : memref<128x48xf32, #tpu.memory_space<vmem>>, vector<128x48xf32>
    %cst_21 = arith.constant dense<0.000000e+00> : vector<128x128xf32>
    %22 = tpu.matmul %21, %20, %cst_21 {dimension_numbers = #tpu.dot_dimension_numbers<[1], [0], [0], [1], [0, 0, 1, 1], [], []>} : vector<128x48xf32>, vector<48x128xf32>, vector<128x128xf32> -> vector<128x128xf32>
    %c0_22 = arith.constant 0 : index
    %c0_23 = arith.constant 0 : index
    %23 = vector.load %arg10[%c0_22, %c0_23] : memref<128x128xf32, #tpu.memory_space<vmem>>, vector<128x128xf32>
    %24 = arith.addf %22, %23 : vector<128x128xf32>
    %cst_24 = arith.constant 0.000000e+00 : f32
    %25 = vector.broadcast %cst_24 : f32 to vector<128x128xf32>
    %26 = arith.maximumf %24, %25 : vector<128x128xf32>
    %c0_25 = arith.constant 0 : index
    %c0_26 = arith.constant 0 : index
    %27 = vector.load %arg7[%c0_25, %c0_26] : memref<192x128xf32, #tpu.memory_space<vmem>>, vector<192x128xf32>
    %cst_27 = arith.constant dense<0.000000e+00> : vector<192x128xf32>
    %28 = tpu.matmul %27, %26, %cst_27 {dimension_numbers = #tpu.dot_dimension_numbers<[1], [0], [0], [1], [0, 0, 1, 1], [], []>} : vector<192x128xf32>, vector<128x128xf32>, vector<192x128xf32> -> vector<192x128xf32>
    %c0_28 = arith.constant 0 : index
    %c0_29 = arith.constant 0 : index
    %29 = vector.load %arg11[%c0_28, %c0_29] : memref<192x128xf32, #tpu.memory_space<vmem>>, vector<192x128xf32>
    %30 = arith.addf %28, %29 : vector<192x128xf32>
    %31 = math.tanh %30 : vector<192x128xf32>
    %c0_30 = arith.constant 0 : index
    %c0_31 = arith.constant 0 : index
    %32 = vector.load %arg12[%c0_30, %c0_31] : memref<192x128xf32, #tpu.memory_space<vmem>>, vector<192x128xf32>
    tpu.vector_store %arg12[%c0_30, %c0_31], %31 {strides = array<i32>} : memref<192x128xf32, #tpu.memory_space<vmem>>, vector<192x128xf32>,
    return
  }
  func.func @transform_0(%arg0: i32) -> (i32, i32) {
    %c0_i32 = arith.constant 0 : i32
    %c0_i32_0 = arith.constant 0 : i32
    %c0_i32_1 = arith.constant 0 : i32
    return %c0_i32, %c0_i32_0 : i32, i32
  }
  func.func @transform_1(%arg0: i32) -> (i32, i32, i32) {
    %c0_i32 = arith.constant 0 : i32
    %c0_i32_0 = arith.constant 0 : i32
    %c0_i32_1 = arith.constant 0 : i32
    %c0_i32_2 = arith.constant 0 : i32
    return %c0_i32, %c0_i32_0, %c0_i32_1 : i32, i32, i32
  }
  func.func @transform_2(%arg0: i32) -> (i32, i32) {
    %c0_i32 = arith.constant 0 : i32
    %c0_i32_0 = arith.constant 0 : i32
    %c0_i32_1 = arith.constant 0 : i32
    return %c0_i32, %c0_i32_0 : i32, i32
  }
  func.func @transform_3(%arg0: i32) -> (i32, i32, i32) {
    %c0_i32 = arith.constant 0 : i32
    %c0_i32_0 = arith.constant 0 : i32
    %c0_i32_1 = arith.constant 0 : i32
    return %arg0, %c0_i32, %c0_i32_0 : i32, i32, i32
  }
  func.func @transform_4(%arg0: i32) -> (i32, i32) {
    %c0_i32 = arith.constant 0 : i32
    %c0_i32_0 = arith.constant 0 : i32
    %c0_i32_1 = arith.constant 0 : i32
    return %c0_i32, %c0_i32_0 : i32, i32
  }
  func.func @transform_5(%arg0: i32) -> (i32, i32) {
    %c0_i32 = arith.constant 0 : i32
    %c0_i32_0 = arith.constant 0 : i32
    %c0_i32_1 = arith.constant 0 : i32
    return %c0_i32, %c0_i32_0 : i32, i32
  }
  func.func @transform_6(%arg0: i32) -> (i32, i32) {
    %c0_i32 = arith.constant 0 : i32
    %c0_i32_0 = arith.constant 0 : i32
    %c0_i32_1 = arith.constant 0 : i32
    return %c0_i32, %c0_i32_0 : i32, i32
  }
  func.func @transform_7(%arg0: i32) -> (i32, i32) {
    %c0_i32 = arith.constant 0 : i32
    %c0_i32_0 = arith.constant 0 : i32
    %c0_i32_1 = arith.constant 0 : i32
    return %c0_i32, %c0_i32_0 : i32, i32
  }
  func.func @transform_8(%arg0: i32) -> (i32, i32) {
    %c0_i32 = arith.constant 0 : i32
    %c0_i32_0 = arith.constant 0 : i32
    %c0_i32_1 = arith.constant 0 : i32
    return %c0_i32, %c0_i32_0 : i32, i32
  }
  func.func @transform_9(%arg0: i32) -> (i32, i32) {
    %c0_i32 = arith.constant 0 : i32
    %c0_i32_0 = arith.constant 0 : i32
    %c0_i32_1 = arith.constant 0 : i32
    return %c0_i32, %c0_i32_0 : i32, i32
  }
  func.func @transform_10(%arg0: i32) -> (i32, i32) {
    %c0_i32 = arith.constant 0 : i32
    %c0_i32_0 = arith.constant 0 : i32
    %c0_i32_1 = arith.constant 0 : i32
    return %c0_i32, %c0_i32_0 : i32, i32
  }
  func.func @transform_11(%arg0: i32) -> (i32, i32) {
    %c0_i32 = arith.constant 0 : i32
    %c0_i32_0 = arith.constant 0 : i32
    return %arg0, %c0_i32 : i32, i32
  }
}

</mosaic_0001>

<bundles_post_ra>
// kernel: tile.38
= control target key start
LH: loop header
LB: loop body
LE: loop exit
PB: predicated region body
PF: predicated region fallthrough
CT: control target
= control target key end

     0   :  { %s22_s0 = inlined_call_operand.vmem [shape: f32[12], index: 0, kind: input, shape index: {}]   ;;  %s23_s1 = inlined_call_operand.vmem [shape: f32[4,12], index: 1, kind: output, shape index: {}]  }
   0x1   :  { %v4_v0 = vld [vmem:[%s22_s0] ss:$0 sm:$0xff] }
   0x2   :  { %5 = vst [vmem:[%s23_s1] sm:$0xf] %v4_v0 }

// kernel: tile.43
= control target key start
LH: loop header
LB: loop body
LE: loop exit
PB: predicated region body
PF: predicated region fallthrough
CT: control target
= control target key end

     0   :  { %s28_s0 = inlined_call_operand.vmem [shape: f32[8], index: 0, kind: input, shape index: {}]   ;;  %s29_s1 = inlined_call_operand.vmem [shape: f32[16,8], index: 1, kind: output, shape index: {}]  }
   0x1   :  { %v4_v0 = vld [vmem:[%s28_s0] ss:$0 sm:$0xff] }
   0x2   :  { %5 = vst [vmem:[%s29_s1] sm:$0xff] %v4_v0 }
   0x3   :  { %8 = vst [vmem:[%s29_s1 + $0x8] sm:$0xff] %v4_v0 }

// kernel: tile.48
= control target key start
LH: loop header
LB: loop body
LE: loop exit
PB: predicated region body
PF: predicated region fallthrough
CT: control target
= control target key end

     0   :  { %2 = vsyncpa [#allocation1], 0  ;;  %s69_s8 = smov [#allocation0]   ;;  %s107_s0 = inlined_call_operand.hbm [shape: f32[3], index: 0, kind: input, shape index: {}]   ;;  %s108_s1 = inlined_call_operand.vmem [shape: f32[64,3], index: 1, kind: output, shape index: {}]  }
   0x1   :  { %s8_s0 = sshll.u32 %s107_s0, 4  ;;  %s10_s9 = sshll.u32 %s69_s8, 4  ;;  %s9_s0 = int_to_ptr.hbm [resolvable:$true] %s8_s0  ;;  %s11_s9 = int_to_ptr.vmem [resolvable:$true] %s10_s9 }
   0x2   :  { %13 = dma.hbm_to_vmem [thread:$0]  %s9_s0, 16, %s11_s9, [#allocation1]  }
   0x3   :  { %67 = dma.done.wait [#allocation1], 16  }
   0x4   :  { %68 = vsyncadd [#allocation1], 4294967280  ;;  %v18_v0 = vld [vmem:[#allocation0] ss:$0 sm:$0xff] }
   0x5   :  { %19 = vst [vmem:[%s108_s1] sm:$0xff] %v18_v0 }
   0x6   :  { %35 = vst [vmem:[%s108_s1 + $0x8] sm:$0xff] %v18_v0 }
   0x7   :  { %36 = vst [vmem:[%s108_s1 + $0x10] sm:$0xff] %v18_v0 }
   0x8   :  { %37 = vst [vmem:[%s108_s1 + $0x18] sm:$0xff] %v18_v0 }
   0x9   :  { %38 = vst [vmem:[%s108_s1 + $0x20] sm:$0xff] %v18_v0 }
   0xa   :  { %39 = vst [vmem:[%s108_s1 + $0x28] sm:$0xff] %v18_v0 }
   0xb   :  { %40 = vst [vmem:[%s108_s1 + $0x30] sm:$0xff] %v18_v0 }
   0xc   :  { %41 = vst [vmem:[%s108_s1 + $0x38] sm:$0xff] %v18_v0 }
   0xd   :  { %34 = vsyncpa [#allocation1], 1 }

// kernel: decoder_forward.1
= control target key start
LH: loop header
LB: loop body
LE: loop exit
PB: predicated region body
PF: predicated region fallthrough
CT: control target
= control target key end

     0   :  { %s1587_s17 = smov 0   ;;  %s2609_s0 = inlined_call_operand.vmem [shape: f32[32,128], index: 0, kind: input, shape index: {}]   ;;  %s2610_s1 = inlined_call_operand.vmem [shape: f32[32,32,128], index: 1, kind: input, shape index: {}]   ;;  %s2611_s2 = inlined_call_operand.vmem [shape: f32[32,128], index: 2, kind: input, shape index: {}]   ;;  %s2612_s3 = inlined_call_operand.vmem [shape: f32[4,24,32], index: 3, kind: input, shape index: {}]   ;;  %s2613_s4 = inlined_call_operand.vmem [shape: f32[48,24], index: 4, kind: input, shape index: {}]   ;;  %s2614_s5 = inlined_call_operand.vmem [shape: f32[128,48], index: 5, kind: input, shape index: {}]   ;;  %s2615_s6 = inlined_call_operand.vmem [shape: f32[192,128], index: 6, kind: input, shape index: {}]   ;;  %s2616_s7 = inlined_call_operand.vmem [shape: f32[24,128], index: 7, kind: input, shape index: {}]   ;;  %s2617_s8 = inlined_call_operand.vmem [shape: f32[48,128], index: 8, kind: input, shape index: {}]   ;;  %s2618_s9 = inlined_call_operand.vmem [shape: f32[128,128], index: 9, kind: input, shape index: {}]   ;;  %s2619_s10 = inlined_call_operand.vmem [shape: f32[192,128], index: 10, kind: input, shape index: {}]   ;;  %s2620_s11 = inlined_call_operand.vmem [shape: f32[768,128], index: 11, kind: output, shape index: {}]  }
   0x1 LB: > { %s1593_s18 = sadd.s32 4294967295, %s1525_s17   ;;  %p1400_p0 = scmp.ge.s32.totalorder %s1525_s17, 1  ;;  %s1525_s17 = sphi %s1587_s17, %s21_s17  }
   0x2   : > { %p337_p1 = scmp.lt.s32.totalorder %s1525_s17, 5 }
   0x4   : > { %p338_p2 = pnand %p1400_p0, %p337_p1 }
   0x5   : > { %p377_p3 = scmp.lt.s32.totalorder (!%p338_p2), %s1593_s18, 3  ;;  %s382_s30 = smul.u32 (!%p338_p2), 24, %s1593_s18 }
   0x6   : > { %341 = sbr.rel (%p338_p2) target bundleno = 956 (0x3bc), region = 64 }
   0x7   : > { %p383_p4 = scmp.lt.s32.totalorder (!%p338_p2), %s382_s30, 95 }
   0xb   : > { %v516_v0 = vld [vmem:[%s2609_s0] sm:$0xff]  ;;  %v391_v6 = vld [vmem:[%s2610_s1 + $0x18] sm:$0xff]  ;;  %v1613_v8 = vld [vmem:[%s2609_s0 + $0x8] sm:$0xff]  ;;  %s378_s13 = scalar_select %p377_p3, %s1593_s18, 3  ;;  %vm882_vm0 = vcmask 261120   ;;  %vm933_vm1 = vcmask 195584  }
   0xc   : > { %v524_v1 = vrot.slane %v516_v0, 1  ;;  %v525_v2 = vrot.slane %v516_v0, 2  ;;  %v526_v3 = vrot.slane %v516_v0, 3  ;;  %v1600_v4 = vperm.slane %v516_v0, 0  ;;  %v395_v7 = vld [vmem:[%s2610_s1 + $0x38] sm:$0xff]  ;;  %v1630_v17 = vld [vmem:[%s2609_s0 + $0x10] sm:$0xff] }
   0xd   : > { %v527_v9 = vrot.slane %v516_v0, 4  ;;  %v399_v11 = vld [vmem:[%s2610_s1 + $0x58] sm:$0xff]  ;;  %v528_v12 = vrot.slane %v516_v0, 5  ;;  %v529_v18 = vrot.slane %v516_v0, 6  ;;  %v530_v19 = vrot.slane %v516_v0, 7  ;;  %v390_v30 = vld [vmem:[%s2610_s1 + $0x10] sm:$0xff] }
   0xe   : > { %v1602_v5 = vperm.slane %v524_v1, 0  ;;  %v1615_v10 = vperm.slane %v525_v2, 0  ;;  %v1620_v13 = vperm.slane %v526_v3, 0  ;;  %v619_v14 = vmul.f32 %v1600_v4, %v391_v6  ;;  %v403_v16 = vld [vmem:[%s2610_s1 + $0x78] sm:$0xff]  ;;  %v394_v31 = vld [vmem:[%s2610_s1 + $0x30] sm:$0xff]  ;;  %s1462_s16 = smul.u32 24, %s378_s13 }
   0xf   : > { %v531_v20 = vrot.slane %v1613_v8, 1  ;;  %v407_v21 = vld [vmem:[%s2610_s1 + $0x98] sm:$0xff]  ;;  %v532_v22 = vrot.slane %v1613_v8, 2  ;;  %v533_v23 = vrot.slane %v1613_v8, 3  ;;  %v1638_v24 = vperm.slane %v527_v9, 0  ;;  %v398_v42 = vld [vmem:[%s2610_s1 + $0x50] sm:$0xff] }
  0x10   : > { %v623_v15 = vmul.f32 %v1602_v5, %v395_v7  ;;  %v627_v25 = vmul.f32 %v1615_v10, %v399_v11  ;;  %v534_v26 = vrot.slane %v1613_v8, 4  ;;  %v535_v27 = vrot.slane %v1613_v8, 5  ;;  %v1654_v32 = vld [vmem:[%s2609_s0 + $0x18] sm:$0xff]  ;;  %v402_v52 = vld [vmem:[%s2610_s1 + $0x70] sm:$0xff]  ;;  %s381_s23 = scalar_lea.vmem %s2612_s3, %s1462_s16  ;;  %s2622_s30 = smov (!%p383_p4, %s382_s30), 95 }
  0x11   : > { %v536_v28 = vrot.slane %v1613_v8, 6  ;;  %v537_v29 = vrot.slane %v1613_v8, 7  ;;  %v538_v33 = vrot.slane %v1630_v17, 1  ;;  %v1657_v34 = vperm.slane %v528_v12, 0  ;;  %v411_v37 = vld [vmem:[%s2610_s1 + $0xb8] sm:$0xff]  ;;  %v406_v62 = vld [vmem:[%s2610_s1 + $0x90] sm:$0xff] }
  0x12   : > { %v631_v35 = vmul.f32 %v1620_v13, %v403_v16  ;;  %v837_v36 = vadd.f32 %v623_v15, %v619_v14  ;;  %v539_v38 = vrot.slane %v1630_v17, 2  ;;  %v540_v39 = vrot.slane %v1630_v17, 3  ;;  %v415_v47 = vld [vmem:[%s2610_s1 + $0xd8] sm:$0xff]  ;;  %v410_v11 = vld [vmem:[%s2610_s1 + $0xb0] sm:$0xff]  ;;  %s1402_s16 = sshll.u32 %s2622_s30, 3 }
  0x13   : > { %v541_v40 = vrot.slane %v1630_v17, 4  ;;  %v1666_v41 = vperm.slane %v529_v18, 0  ;;  %v635_v43 = vmul.f32 %v1638_v24, %v407_v21  ;;  %v618_v45 = vmul.f32 %v1600_v4, %v390_v30  ;;  %v419_v57 = vld [vmem:[%s2610_s1 + $0xf8] sm:$0xff]  ;;  %v389_v18 = vld [vmem:[%s2610_s1 + $0x8] sm:$0xff]  ;;  %s2517_s22 = scalar_lea.vmem %s2620_s11, %s1402_s16 }
  0x14   : > { %v838_v44 = vadd.f32 %v837_v36, %v627_v25  ;;  %v622_v46 = vmul.f32 %v1602_v5, %v394_v31  ;;  %v542_v48 = vrot.slane %v1630_v17, 5  ;;  %v543_v49 = vrot.slane %v1630_v17, 6  ;;  %v423_v3 = vld [vmem:[%s2610_s1 + $0x118] sm:$0xff] }
  0x15   : > { %v544_v50 = vrot.slane %v1630_v17, 7  ;;  %v545_v51 = vrot.slane %v1654_v32, 1  ;;  %v1684_v53 = vperm.slane %v530_v19, 0  ;;  %v639_v54 = vmul.f32 %v1657_v34, %v411_v37  ;;  %v393_v19 = vld [vmem:[%s2610_s1 + $0x28] sm:$0xff] }
  0x16   : > { %v839_v55 = vadd.f32 %v838_v44, %v631_v35  ;;  %v626_v56 = vmul.f32 %v1615_v10, %v398_v42  ;;  %v546_v58 = vrot.slane %v1654_v32, 2  ;;  %v547_v59 = vrot.slane %v1654_v32, 3  ;;  %v414_v35 = vld [vmem:[%s2610_s1 + $0xd0] sm:$0xff] }
  0x17   : > { %v548_v60 = vrot.slane %v1654_v32, 4  ;;  %v1695_v61 = vperm.slane %v1613_v8, 0  ;;  %v643_v63 = vmul.f32 %v1666_v41, %v415_v47  ;;  %v630_v1 = vmul.f32 %v1620_v13, %v402_v52  ;;  %v418_v44 = vld [vmem:[%s2610_s1 + $0xf0] sm:$0xff] }
  0x18   : > { %v840_v0 = vadd.f32 %v839_v55, %v635_v43  ;;  %v806_v2 = vadd.f32 %v622_v46, %v618_v45  ;;  %v549_v6 = vrot.slane %v1654_v32, 5  ;;  %v550_v7 = vrot.slane %v1654_v32, 6 }
  0x19   : > { %v551_v8 = vrot.slane %v1654_v32, 7  ;;  %v1708_v9 = vperm.slane %v531_v20, 0  ;;  %v647_v12 = vmul.f32 %v1684_v53, %v419_v57  ;;  %v634_v15 = vmul.f32 %v1638_v24, %v406_v62  ;;  %v427_v20 = vld [vmem:[%s2610_s1 + $0x138] sm:$0xff] }
  0x1a   : > { %v841_v14 = vadd.f32 %v840_v0, %v639_v54  ;;  %v807_v16 = vadd.f32 %v806_v2, %v626_v56  ;;  %v1724_v21 = vperm.slane %v532_v22, 0  ;;  %v1726_v25 = vperm.slane %v533_v23, 0  ;;  %v397_v22 = vld [vmem:[%s2610_s1 + $0x48] sm:$0xff]  ;;  %v431_v23 = vld [vmem:[%s2610_s1 + $0x158] sm:$0xff] }
  0x1b   : > { %v1728_v30 = vperm.slane %v534_v26, 0  ;;  %v1730_v31 = vperm.slane %v535_v27, 0  ;;  %v651_v36 = vmul.f32 %v1695_v61, %v423_v3  ;;  %v638_v42 = vmul.f32 %v1657_v34, %v410_v11 }
  0x1c   : > { %v842_v37 = vadd.f32 %v841_v14, %v643_v63  ;;  %v808_v43 = vadd.f32 %v807_v16, %v630_v1  ;;  %v1743_v26 = vperm.slane %v536_v28, 0  ;;  %v1745_v27 = vperm.slane %v537_v29, 0  ;;  %v401_v28 = vld [vmem:[%s2610_s1 + $0x68] sm:$0xff]  ;;  %v435_v29 = vld [vmem:[%s2610_s1 + $0x178] sm:$0xff]  ;;  %v422_v63 = vld [vmem:[%s2610_s1 + $0x110] sm:$0xff] }
  0x1d   : > { %v617_v45 = vmul.f32 %v1600_v4, %v389_v18  ;;  %v621_v46 = vmul.f32 %v1602_v5, %v393_v19  ;;  %v655_v47 = vmul.f32 %v1708_v9, %v427_v20  ;;  %v642_v54 = vmul.f32 %v1666_v41, %v414_v35 }
  0x1e   : > { %v843_v52 = vadd.f32 %v842_v37, %v647_v12  ;;  %v809_v55 = vadd.f32 %v808_v43, %v634_v15  ;;  %v1761_v56 = vperm.slane %v1630_v17, 0  ;;  %v1765_v57 = vperm.slane %v538_v33, 0  ;;  %v405_v33 = vld [vmem:[%s2610_s1 + $0x88] sm:$0xff]  ;;  %v426_v15 = vld [vmem:[%s2610_s1 + $0x130] sm:$0xff] }
  0x1f   : > { %v1769_v62 = vperm.slane %v539_v38, 0  ;;  %v625_v0 = vmul.f32 %v1615_v10, %v397_v22  ;;  %v659_v1 = vmul.f32 %v1724_v21, %v431_v23  ;;  %v646_v3 = vmul.f32 %v1684_v53, %v418_v44  ;;  %v439_v38 = vld [vmem:[%s2610_s1 + $0x198] sm:$0xff]  ;;  %v430_v43 = vld [vmem:[%s2610_s1 + $0x150] sm:$0xff]  ;;  %v417_v17 = vld [vmem:[%s2610_s1 + $0xe8] sm:$0xff] }
  0x20   : > { %v844_v2 = vadd.f32 %v843_v52, %v651_v36  ;;  %v810_v11 = vadd.f32 %v809_v55, %v638_v42  ;;  %v1785_v12 = vperm.slane %v540_v39, 0  ;;  %v1789_v14 = vperm.slane %v541_v40, 0  ;;  %v409_v39 = vld [vmem:[%s2610_s1 + $0xa8] sm:$0xff]  ;;  %v443_v40 = vld [vmem:[%s2610_s1 + $0x1b8] sm:$0xff]  ;;  %v434_v55 = vld [vmem:[%s2610_s1 + $0x170] sm:$0xff] }
  0x21   : > { %v629_v16 = vmul.f32 %v1620_v13, %v401_v28  ;;  %v775_v18 = vadd.f32 %v621_v46, %v617_v45  ;;  %v663_v19 = vmul.f32 %v1726_v25, %v435_v29  ;;  %v650_v35 = vmul.f32 %v1695_v61, %v422_v63 }
  0x22   : > { %v845_v20 = vadd.f32 %v844_v2, %v655_v47  ;;  %v811_v36 = vadd.f32 %v810_v11, %v642_v54  ;;  %v1805_v37 = vperm.slane %v542_v48, 0  ;;  %v1809_v42 = vperm.slane %v543_v49, 0  ;;  %v413_v48 = vld [vmem:[%s2610_s1 + $0xc8] sm:$0xff]  ;;  %v447_v49 = vld [vmem:[%s2610_s1 + $0x1d8] sm:$0xff] }
  0x23   : > { %v633_v22 = vmul.f32 %v1638_v24, %v405_v33  ;;  %v776_v23 = vadd.f32 %v775_v18, %v625_v0  ;;  %v667_v44 = vmul.f32 %v1728_v30, %v439_v38  ;;  %v654_v46 = vmul.f32 %v1708_v9, %v426_v15  ;;  %v438_v33 = vld [vmem:[%s2610_s1 + $0x190] sm:$0xff] }
  0x24   : > { %v846_v45 = vadd.f32 %v845_v20, %v659_v1  ;;  %v812_v47 = vadd.f32 %v811_v36, %v646_v3  ;;  %v1825_v52 = vperm.slane %v544_v50, 0  ;;  %v1828_v54 = vperm.slane %v1654_v32, 0  ;;  %v451_v50 = vld [vmem:[%s2610_s1 + $0x1f8] sm:$0xff]  ;;  %v437_v32 = vld [vmem:[%s2610_s1 + $0x188] sm:$0xff] }
  0x25   : > { %v637_v28 = vmul.f32 %v1657_v34, %v409_v39  ;;  %v777_v29 = vadd.f32 %v776_v23, %v629_v16  ;;  %v671_v63 = vmul.f32 %v1730_v31, %v443_v40  ;;  %v658_v1 = vmul.f32 %v1724_v21, %v430_v43  ;;  %v442_v39 = vld [vmem:[%s2610_s1 + $0x1b0] sm:$0xff] }
  0x26   : > { %v847_v0 = vadd.f32 %v846_v45, %v663_v19  ;;  %v813_v2 = vadd.f32 %v812_v47, %v650_v35  ;;  %v1844_v3 = vperm.slane %v545_v51, 0  ;;  %v1848_v11 = vperm.slane %v546_v58, 0  ;;  %v421_v51 = vld [vmem:[%s2610_s1 + $0x108] sm:$0xff]  ;;  %v455_v58 = vld [vmem:[%s2610_s1 + $0x218] sm:$0xff] }
  0x27   : > { %v641_v38 = vmul.f32 %v1666_v41, %v413_v48  ;;  %v778_v15 = vadd.f32 %v777_v29, %v633_v22  ;;  %v675_v16 = vmul.f32 %v1743_v26, %v447_v49  ;;  %v662_v19 = vmul.f32 %v1726_v25, %v434_v55  ;;  %v459_v47 = vld [vmem:[%s2610_s1 + $0x238] sm:$0xff]  ;;  %v446_v55 = vld [vmem:[%s2610_s1 + $0x1d0] sm:$0xff] }
  0x28   : > { %v848_v18 = vadd.f32 %v847_v0, %v667_v44  ;;  %v814_v20 = vadd.f32 %v813_v2, %v654_v46  ;;  %v1864_v35 = vperm.slane %v547_v59, 0  ;;  %v1868_v36 = vperm.slane %v548_v60, 0  ;;  %v425_v59 = vld [vmem:[%s2610_s1 + $0x128] sm:$0xff]  ;;  %v388_v60 = vld [vmem:[%s2610_s1] sm:$0xff] }
  0x29   : > { %v645_v40 = vmul.f32 %v1684_v53, %v417_v17  ;;  %v779_v43 = vadd.f32 %v778_v15, %v637_v28  ;;  %v679_v22 = vmul.f32 %v1745_v27, %v451_v50  ;;  %v666_v44 = vmul.f32 %v1728_v30, %v438_v33  ;;  %v392_v46 = vld [vmem:[%s2610_s1 + $0x20] sm:$0xff]  ;;  %v463_v17 = vld [vmem:[%s2610_s1 + $0x258] sm:$0xff]  ;;  %v450_v50 = vld [vmem:[%s2610_s1 + $0x1f0] sm:$0xff] }
  0x2a   : > { %v849_v23 = vadd.f32 %v848_v18, %v671_v63  ;;  %v815_v45 = vadd.f32 %v814_v20, %v658_v1  ;;  %v1890_v48 = vperm.slane %v549_v6, 0  ;;  %v1894_v49 = vperm.slane %v550_v7, 0  ;;  %v429_v6 = vld [vmem:[%s2610_s1 + $0x148] sm:$0xff]  ;;  %v396_v7 = vld [vmem:[%s2610_s1 + $0x40] sm:$0xff] }
  0x2b   : > { %v649_v28 = vmul.f32 %v1695_v61, %v421_v51  ;;  %v780_v29 = vadd.f32 %v779_v43, %v641_v38  ;;  %v683_v63 = vmul.f32 %v1761_v56, %v455_v58  ;;  %v670_v1 = vmul.f32 %v1730_v31, %v442_v39  ;;  %v433_v58 = vld [vmem:[%s2610_s1 + $0x168] sm:$0xff]  ;;  %v400_v39 = vld [vmem:[%s2610_s1 + $0x60] sm:$0xff] }
  0x2c   : > { %v850_v0 = vadd.f32 %v849_v23, %v675_v16  ;;  %v816_v2 = vadd.f32 %v815_v45, %v662_v19  ;;  %v653_v33 = vmul.f32 %v1708_v9, %v425_v59  ;;  %v616_v15 = vmul.f32 %v1600_v4, %v388_v60  ;;  %v467_v4 = vld [vmem:[%s2610_s1 + $0x278] sm:$0xff] }
  0x2d   : > { %v781_v38 = vadd.f32 %v780_v29, %v645_v40  ;;  %v620_v16 = vmul.f32 %v1602_v5, %v392_v46  ;;  %v687_v18 = vmul.f32 %v1765_v57, %v459_v47  ;;  %v674_v20 = vmul.f32 %v1743_v26, %v446_v55  ;;  %v454_v40 = vld [vmem:[%s2610_s1 + $0x210] sm:$0xff]  ;;  %v471_v46 = vld [vmem:[%s2610_s1 + $0x298] sm:$0xff] }
  0x2e   : > { %v851_v19 = vadd.f32 %v850_v0, %v679_v22  ;;  %v817_v51 = vadd.f32 %v816_v2, %v666_v44  ;;  %v1930_v5 = vperm.slane %v551_v8, 0  ;;  %v657_v43 = vmul.f32 %v1724_v21, %v429_v6  ;;  %v404_v8 = vld [vmem:[%s2610_s1 + $0x80] sm:$0xff]  ;;  %v441_v6 = vld [vmem:[%s2610_s1 + $0x1a8] sm:$0xff] }
  0x2f   : > { %v782_v22 = vadd.f32 %v781_v38, %v649_v28  ;;  %v624_v23 = vmul.f32 %v1615_v10, %v396_v7  ;;  %v691_v44 = vmul.f32 %v1769_v62, %v463_v17  ;;  %v678_v59 = vmul.f32 %v1745_v27, %v450_v50  ;;  %v458_v10 = vld [vmem:[%s2610_s1 + $0x230] sm:$0xff]  ;;  %v408_v7 = vld [vmem:[%s2610_s1 + $0xa0] sm:$0xff]  ;;  %v475_v17 = vld [vmem:[%s2610_s1 + $0x2b8] sm:$0xff] }
  0x30   : > { %v852_v45 = vadd.f32 %v851_v19, %v683_v63  ;;  %v818_v60 = vadd.f32 %v817_v51, %v670_v1  ;;  %v661_v47 = vmul.f32 %v1726_v25, %v433_v58  ;;  %v628_v28 = vmul.f32 %v1620_v13, %v400_v39  ;;  %v462_v13 = vld [vmem:[%s2610_s1 + $0x250] sm:$0xff]  ;;  %v445_v51 = vld [vmem:[%s2610_s1 + $0x1c8] sm:$0xff]  ;;  %v412_v58 = vld [vmem:[%s2610_s1 + $0xc0] sm:$0xff] }
  0x31   : > { %v783_v55 = vadd.f32 %v782_v22, %v653_v33  ;;  %v744_v29 = vadd.f32 %v620_v16, %v616_v15  ;;  %v695_v63 = vmul.f32 %v1785_v12, %v467_v4  ;;  %v682_v1 = vmul.f32 %v1761_v56, %v454_v40  ;;  %v479_v39 = vld [vmem:[%s2610_s1 + $0x2d8] sm:$0xff] }
  0x32   : > { %v853_v0 = vadd.f32 %v852_v45, %v687_v18  ;;  %v819_v2 = vadd.f32 %v818_v60, %v674_v20  ;;  %v665_v50 = vmul.f32 %v1728_v30, %v437_v32  ;;  %v632_v38 = vmul.f32 %v1638_v24, %v404_v8  ;;  %v466_v24 = vld [vmem:[%s2610_s1 + $0x270] sm:$0xff]  ;;  %v449_v60 = vld [vmem:[%s2610_s1 + $0x1e8] sm:$0xff]  ;;  %v416_v32 = vld [vmem:[%s2610_s1 + $0xe0] sm:$0xff] }
  0x33   : > { %v784_v33 = vadd.f32 %v783_v55, %v657_v43  ;;  %v745_v15 = vadd.f32 %v744_v29, %v624_v23  ;;  %v699_v16 = vmul.f32 %v1789_v14, %v471_v46  ;;  %v686_v19 = vmul.f32 %v1765_v57, %v458_v10  ;;  %v483_v8 = vld [vmem:[%s2610_s1 + $0x2f8] sm:$0xff] }
  0x34   : > { %v854_v18 = vadd.f32 %v853_v0, %v691_v44  ;;  %v820_v20 = vadd.f32 %v819_v2, %v678_v59  ;;  %v669_v4 = vmul.f32 %v1730_v31, %v441_v6  ;;  %v636_v43 = vmul.f32 %v1657_v34, %v408_v7  ;;  %v470_v34 = vld [vmem:[%s2610_s1 + $0x290] sm:$0xff]  ;;  %v420_v2 = vld [vmem:[%s2610_s1 + $0x100] sm:$0xff]  ;;  %v487_v6 = vld [vmem:[%s2610_s1 + $0x318] sm:$0xff] }
  0x35   : > { %v785_v40 = vadd.f32 %v784_v33, %v661_v47  ;;  %v746_v22 = vadd.f32 %v745_v15, %v628_v28  ;;  %v703_v23 = vmul.f32 %v1805_v37, %v475_v17  ;;  %v690_v45 = vmul.f32 %v1769_v62, %v462_v13 }
  0x36   : > { %v855_v44 = vadd.f32 %v854_v18, %v695_v63  ;;  %v821_v59 = vadd.f32 %v820_v20, %v682_v1  ;;  %v673_v46 = vmul.f32 %v1743_v26, %v445_v51  ;;  %v640_v47 = vmul.f32 %v1666_v41, %v412_v58  ;;  %v453_v1 = vld [vmem:[%s2610_s1 + $0x208] sm:$0xff]  ;;  %v474_v41 = vld [vmem:[%s2610_s1 + $0x2b0] sm:$0xff]  ;;  %v491_v20 = vld [vmem:[%s2610_s1 + $0x338] sm:$0xff] }
  0x37   : > { %v786_v10 = vadd.f32 %v785_v40, %v665_v50  ;;  %v747_v55 = vadd.f32 %v746_v22, %v632_v38  ;;  %v707_v28 = vmul.f32 %v1809_v42, %v479_v39  ;;  %v694_v63 = vmul.f32 %v1785_v12, %v466_v24  ;;  %v457_v18 = vld [vmem:[%s2610_s1 + $0x228] sm:$0xff] }
  0x38   : > { %v856_v29 = vadd.f32 %v855_v44, %v699_v16  ;;  %v822_v0 = vadd.f32 %v821_v59, %v686_v19  ;;  %v677_v7 = vmul.f32 %v1745_v27, %v449_v60  ;;  %v644_v13 = vmul.f32 %v1684_v53, %v416_v32  ;;  %v424_v19 = vld [vmem:[%s2610_s1 + $0x120] sm:$0xff]  ;;  %v478_v53 = vld [vmem:[%s2610_s1 + $0x2d0] sm:$0xff] }
  0x39   : > { %v787_v17 = vadd.f32 %v786_v10, %v669_v4  ;;  %v748_v50 = vadd.f32 %v747_v55, %v636_v43  ;;  %v711_v33 = vmul.f32 %v1825_v52, %v483_v8  ;;  %v698_v15 = vmul.f32 %v1789_v14, %v470_v34  ;;  %v428_v44 = vld [vmem:[%s2610_s1 + $0x140] sm:$0xff]  ;;  %v465_v55 = vld [vmem:[%s2610_s1 + $0x268] sm:$0xff] }
  0x3a   : > { %v857_v38 = vadd.f32 %v856_v29, %v703_v23  ;;  %v823_v16 = vadd.f32 %v822_v0, %v690_v45  ;;  %v681_v51 = vmul.f32 %v1761_v56, %v453_v1  ;;  %v648_v39 = vmul.f32 %v1695_v61, %v420_v2  ;;  %v461_v23 = vld [vmem:[%s2610_s1 + $0x248] sm:$0xff]  ;;  %v495_v45 = vld [vmem:[%s2610_s1 + $0x358] sm:$0xff]  ;;  %v482_v61 = vld [vmem:[%s2610_s1 + $0x2f0] sm:$0xff] }
  0x3b   : > { %v788_v58 = vadd.f32 %v787_v17, %v673_v46  ;;  %v749_v24 = vadd.f32 %v748_v50, %v640_v47  ;;  %v715_v4 = vmul.f32 %v1828_v54, %v487_v6  ;;  %v702_v43 = vmul.f32 %v1805_v37, %v474_v41  ;;  %v499_v29 = vld [vmem:[%s2610_s1 + $0x378] sm:$0xff]  ;;  %v436_v50 = vld [vmem:[%s2610_s1 + $0x180] sm:$0xff] }
  0x3c   : > { %v858_v40 = vadd.f32 %v857_v38, %v707_v28  ;;  %v824_v22 = vadd.f32 %v823_v16, %v694_v63  ;;  %v685_v59 = vmul.f32 %v1765_v57, %v457_v18  ;;  %v652_v32 = vmul.f32 %v1708_v9, %v424_v19  ;;  %v432_v28 = vld [vmem:[%s2610_s1 + $0x160] sm:$0xff]  ;;  %v486_v9 = vld [vmem:[%s2610_s1 + $0x310] sm:$0xff] }
  0x3d   : > { %v789_v60 = vadd.f32 %v788_v58, %v677_v7  ;;  %v750_v8 = vadd.f32 %v749_v24, %v644_v13  ;;  %v719_v34 = vmul.f32 %v1844_v3, %v491_v20  ;;  %v706_v10 = vmul.f32 %v1809_v42, %v478_v53  ;;  %v469_v13 = vld [vmem:[%s2610_s1 + $0x288] sm:$0xff]  ;;  %v507_v24 = vld [vmem:[%s2610_s1 + $0x3b8] sm:$0xff] }
  0x3e   : > { %v859_v46 = vadd.f32 %v858_v40, %v711_v33  ;;  %v825_v47 = vadd.f32 %v824_v22, %v698_v15  ;;  %v689_v63 = vmul.f32 %v1769_v62, %v461_v23  ;;  %v656_v1 = vmul.f32 %v1724_v21, %v428_v44  ;;  %v503_v33 = vld [vmem:[%s2610_s1 + $0x398] sm:$0xff]  ;;  %v490_v21 = vld [vmem:[%s2610_s1 + $0x330] sm:$0xff]  ;;  %v473_v58 = vld [vmem:[%s2610_s1 + $0x2a8] sm:$0xff] }
  0x3f   : > { %v790_v0 = vadd.f32 %v789_v60, %v681_v51  ;;  %v751_v2 = vadd.f32 %v750_v8, %v648_v39  ;;  %v723_v6 = vmul.f32 %v1848_v11, %v495_v45  ;;  %v710_v7 = vmul.f32 %v1825_v52, %v482_v61  ;;  %v440_v39 = vld [vmem:[%s2610_s1 + $0x1a0] sm:$0xff] }
  0x40   : > { %v860_v41 = vadd.f32 %v859_v46, %v715_v4  ;;  %v826_v17 = vadd.f32 %v825_v47, %v702_v43  ;;  %v693_v38 = vmul.f32 %v1785_v12, %v465_v55  ;;  %v660_v16 = vmul.f32 %v1726_v25, %v432_v28  ;;  %v494_v25 = vld [vmem:[%s2610_s1 + $0x350] sm:$0xff]  ;;  %v444_v60 = vld [vmem:[%s2610_s1 + $0x1c0] sm:$0xff] }
  0x41   : > { %v791_v15 = vadd.f32 %v790_v0, %v685_v59  ;;  %v752_v18 = vadd.f32 %v751_v2, %v652_v32  ;;  %v727_v19 = vmul.f32 %v1864_v35, %v499_v29  ;;  %v714_v53 = vmul.f32 %v1828_v54, %v486_v9  ;;  %v477_v59 = vld [vmem:[%s2610_s1 + $0x2c8] sm:$0xff]  ;;  %v511_v32 = vld [vmem:[%s2610_s1 + $0x3d8] sm:$0xff] }
  0x42   : > { %v861_v20 = vadd.f32 %v860_v41, %v719_v34  ;;  %v827_v51 = vadd.f32 %v826_v17, %v706_v10  ;;  %v697_v4 = vmul.f32 %v1789_v14, %v469_v13  ;;  %v664_v43 = vmul.f32 %v1728_v30, %v436_v50  ;;  %v498_v30 = vld [vmem:[%s2610_s1 + $0x370] sm:$0xff]  ;;  %v481_v9 = vld [vmem:[%s2610_s1 + $0x2e8] sm:$0xff]  ;;  %v515_v0 = vld [vmem:[%s2610_s1 + $0x3f8] sm:$0xff] }
  0x43   : > { %v792_v40 = vadd.f32 %v791_v15, %v689_v63  ;;  %v753_v22 = vadd.f32 %v752_v18, %v656_v1  ;;  %v731_v23 = vmul.f32 %v1868_v36, %v503_v33  ;;  %v718_v45 = vmul.f32 %v1844_v3, %v490_v21  ;;  %v448_v63 = vld [vmem:[%s2610_s1 + $0x1e0] sm:$0xff]  ;;  %v485_v33 = vld [vmem:[%s2610_s1 + $0x308] sm:$0xff] }
  0x44   : > { %v862_v44 = vadd.f32 %v861_v20, %v723_v6  ;;  %v828_v61 = vadd.f32 %v827_v51, %v710_v7  ;;  %v701_v8 = vmul.f32 %v1805_v37, %v473_v58  ;;  %v668_v46 = vmul.f32 %v1730_v31, %v440_v39  ;;  %v502_v31 = vld [vmem:[%s2610_s1 + $0x390] sm:$0xff]  ;;  %v452_v21 = vld [vmem:[%s2610_s1 + $0x200] sm:$0xff]  ;;  %v489_v58 = vld [vmem:[%s2610_s1 + $0x328] sm:$0xff] }
  0x45   : > { %v793_v34 = vadd.f32 %v792_v40, %v693_v38  ;;  %v754_v10 = vadd.f32 %v753_v22, %v660_v16  ;;  %v735_v47 = vmul.f32 %v1890_v48, %v507_v24  ;;  %v722_v28 = vmul.f32 %v1848_v11, %v494_v25  ;;  %v506_v38 = vld [vmem:[%s2610_s1 + $0x3b0] sm:$0xff]  ;;  %v456_v39 = vld [vmem:[%s2610_s1 + $0x220] sm:$0xff] }
  0x46   : > { %v863_v55 = vadd.f32 %v862_v44, %v727_v19  ;;  %v829_v29 = vadd.f32 %v828_v61, %v714_v53  ;;  %v705_v1 = vmul.f32 %v1809_v42, %v477_v59  ;;  %v672_v6 = vmul.f32 %v1743_v26, %v444_v60  ;;  %v510_v24 = vld [vmem:[%s2610_s1 + $0x3d0] sm:$0xff]  ;;  %v493_v44 = vld [vmem:[%s2610_s1 + $0x348] sm:$0xff]  ;;  %v871_v61 = vld [vmem:[%s2611_s2 + $0x18] sm:$0xff] }
  0x47   : > { %v794_v2 = vadd.f32 %v793_v34, %v697_v4  ;;  %v755_v41 = vadd.f32 %v754_v10, %v664_v43  ;;  %v739_v7 = vmul.f32 %v1894_v49, %v511_v32  ;;  %v726_v13 = vmul.f32 %v1864_v35, %v498_v30  ;;  %v497_v10 = vld [vmem:[%s2610_s1 + $0x368] sm:$0xff] }
  0x48   : > { %v864_v17 = vadd.f32 %v863_v55, %v731_v23  ;;  %v830_v50 = vadd.f32 %v829_v29, %v718_v45  ;;  %v709_v26 = vmul.f32 %v1825_v52, %v481_v9  ;;  %v676_v16 = vmul.f32 %v1745_v27, %v448_v63  ;;  %v460_v45 = vld [vmem:[%s2610_s1 + $0x240] sm:$0xff] }
  0x49   : > { %v795_v15 = vadd.f32 %v794_v2, %v701_v8  ;;  %v756_v18 = vadd.f32 %v755_v41, %v668_v46  ;;  %v743_v19 = vmul.f32 %v1930_v5, %v515_v0  ;;  %v730_v53 = vmul.f32 %v1868_v36, %v502_v31  ;;  %v501_v31 = vld [vmem:[%s2610_s1 + $0x388] sm:$0xff] }
  0x4a   : > { %v865_v20 = vadd.f32 %v864_v17, %v735_v47  ;;  %v831_v51 = vadd.f32 %v830_v50, %v722_v28  ;;  %v713_v27 = vmul.f32 %v1828_v54, %v485_v33  ;;  %v680_v4 = vmul.f32 %v1761_v56, %v452_v21  ;;  %v514_v56 = vld [vmem:[%s2610_s1 + $0x3f0] sm:$0xff]  ;;  %v464_v47 = vld [vmem:[%s2610_s1 + $0x260] sm:$0xff]  ;;  %v505_v17 = vld [vmem:[%s2610_s1 + $0x3a8] sm:$0xff] }
  0x4b   : > { %v796_v25 = vadd.f32 %v795_v15, %v705_v1  ;;  %v757_v40 = vadd.f32 %v756_v18, %v672_v6  ;;  %v734_v22 = vmul.f32 %v1890_v48, %v506_v38  ;;  %v717_v59 = vmul.f32 %v1844_v3, %v489_v58  ;;  %v468_v1 = vld [vmem:[%s2610_s1 + $0x280] sm:$0xff]  ;;  %v870_v50 = vld [vmem:[%s2611_s2 + $0x10] sm:$0xff]  ;;  %v509_v15 = vld [vmem:[%s2610_s1 + $0x3c8] sm:$0xff] }
  0x4c   : > { %v866_v43 = vadd.f32 %v865_v20, %v739_v7  ;;  %v832_v23 = vadd.f32 %v831_v51, %v726_v13  ;;  %v684_v32 = vmul.f32 %v1765_v57, %v456_v39  ;;  %v738_v34 = vmul.f32 %v1894_v49, %v510_v24  ;;  %v472_v13 = vld [vmem:[%s2610_s1 + $0x2a0] sm:$0xff] }
  0x4d   : > { %v797_v60 = vadd.f32 %v796_v25, %v709_v26  ;;  %v758_v30 = vadd.f32 %v757_v40, %v676_v16  ;;  %v721_v55 = vmul.f32 %v1848_v11, %v493_v44  ;;  %v688_v29 = vmul.f32 %v1769_v62, %v460_v45  ;;  %v476_v16 = vld [vmem:[%s2610_s1 + $0x2c0] sm:$0xff] }
  0x4e   : > { %v867_v8 = vadd.f32 %v866_v43, %v743_v19  ;;  %v833_v46 = vadd.f32 %v832_v23, %v730_v53  ;;  %v742_v63 = vmul.f32 %v1930_v5, %v514_v56  ;;  %v725_v2 = vmul.f32 %v1864_v35, %v497_v10  ;;  %v480_v58 = vld [vmem:[%s2610_s1 + $0x2e0] sm:$0xff] }
  0x4f   : > { %v798_v28 = vadd.f32 %v797_v60, %v713_v27  ;;  %v759_v9 = vadd.f32 %v758_v30, %v680_v4  ;;  %v692_v41 = vmul.f32 %v1785_v12, %v464_v47  ;;  %v729_v33 = vmul.f32 %v1868_v36, %v501_v31  ;;  %v488_v23 = vld [vmem:[%s2610_s1 + $0x320] sm:$0xff] }
  0x50   : > { %v875_v57 = vadd.f32 %v871_v61, %v867_v8  ;;  %v834_v0 = vadd.f32 %v833_v46, %v734_v22  ;;  %v696_v12 = vmul.f32 %v1789_v14, %v468_v1  ;;  %v733_v18 = vmul.f32 %v1890_v48, %v505_v17  ;;  %v513_v14 = vld [vmem:[%s2610_s1 + $0x3e8] sm:$0xff]  ;;  %v492_v56 = vld [vmem:[%s2610_s1 + $0x340] sm:$0xff] }
  0x51   : > { %v799_v6 = vadd.f32 %v798_v28, %v717_v59  ;;  %v760_v7 = vadd.f32 %v759_v9, %v684_v32  ;;  %v700_v20 = vmul.f32 %v1805_v37, %v472_v13  ;;  %v737_v39 = vmul.f32 %v1894_v49, %v509_v15  ;;  %v484_v37 = vld [vmem:[%s2610_s1 + $0x300] sm:$0xff]  ;;  %v869_v61 = vld [vmem:[%s2611_s2 + $0x8] sm:$0xff] }
  0x52   : > { %904 = vmatpush.msra.mxu0 %v875_v57  ;;  %v835_v62 = vadd.f32 %v834_v0, %v738_v34  ;;  %v704_v27 = vmul.f32 %v1809_v42, %v476_v16  ;;  %v741_v4 = vmul.f32 %v1930_v5, %v513_v14  ;;  %v708_v43 = vmul.f32 %v1825_v52, %v480_v58  ;;  %v496_v32 = vld [vmem:[%s2610_s1 + $0x360] sm:$0xff]  ;;  %v922_v16 = vld [vmem:[%s2613_s4 + $0x8] sm:$0xff] }
  0x53   : > { %v800_v21 = vadd.f32 %v799_v6, %v721_v55  ;;  %v761_v38 = vadd.f32 %v760_v7, %v688_v29  ;;  %v712_v42 = vmul.f32 %v1828_v54, %v484_v37  ;;  %v716_v52 = vmul.f32 %v1844_v3, %v488_v23  ;;  %v500_v34 = vld [vmem:[%s2610_s1 + $0x380] sm:$0xff]  ;;  %v878_v6 = vld [vmem:[%s381_s23 + $0x10] sm:$0xff]  ;;  %v880_v7 = vld [vmem:[%s2616_s7 + $0x8] sm:$0xff] }
  0x54   : > { %v836_v26 = vadd.f32 %v835_v62, %v742_v63  ;;  %v720_v54 = vmul.f32 %v1848_v11, %v492_v56  ;;  %v724_v46 = vmul.f32 %v1864_v35, %v496_v32  ;;  %v504_v3 = vld [vmem:[%s2610_s1 + $0x3a0] sm:$0xff]  ;;  %v728_v47 = vmul.f32 %v1868_v36, %v500_v34  ;;  %v881_v62 = vld [vmem:[%s2616_s7 + $0x10] sm:$0xff]  ;;  %v930_v37 = vld [vmem:[%s2617_s8 + $0x18] sm:$0xff] }
  0x55   : > { %v801_v19 = vadd.f32 %v800_v21, %v725_v2  ;;  %v762_v53 = vadd.f32 %v761_v38, %v692_v41  ;;  %v508_v11 = vld [vmem:[%s2610_s1 + $0x3c0] sm:$0xff]  ;;  %v732_v28 = vmul.f32 %v1890_v48, %v504_v3  ;;  %vm1025_vm2 = vcmask 392192   ;;  %v994_v34 = vld [vmem:[%s2614_s5 + $0x8] sm:$0xff] }
  0x56   : > { %v874_v51 = vadd.f32 %v870_v50, %v836_v26  ;;  %v512_v35 = vld [vmem:[%s2610_s1 + $0x3e0] sm:$0xff]  ;;  %v736_v9 = vmul.f32 %v1894_v49, %v508_v11  ;;  %v877_v49 = vld [vmem:[%s381_s23 + $0x8] sm:$0xff]  ;;  %v1000_v11 = vld [vmem:[%s2614_s5 + $0x38] sm:$0xff] }
  0x57   : > { %v802_v24 = vadd.f32 %v801_v19, %v729_v33  ;;  %v763_v25 = vadd.f32 %v762_v53, %v696_v12  ;;  %v740_v63 = vmul.f32 %v1930_v5, %v512_v35  ;;  %v868_v31 = vld [vmem:[%s2611_s2] sm:$0xff]  ;;  %v924_v19 = vld [vmem:[%s2613_s4 + $0x18] sm:$0xff]  ;;  %v926_v53 = vld [vmem:[%s2613_s4 + $0x28] sm:$0xff] }
  0x58   : > { %905 = vmatpush.msra.mxu0 %v874_v51  ;;  %v876_v2 = vld [vmem:[%s381_s23] sm:$0xff]  ;;  %v1003_v35 = vld [vmem:[%s2614_s5 + $0x50] sm:$0xff] }
  0x59   : > { %v803_v40 = vadd.f32 %v802_v24, %v733_v18  ;;  %v764_v22 = vadd.f32 %v763_v25, %v700_v20  ;;  %v879_v17 = vld [vmem:[%s2616_s7] sm:$0xff]  ;;  %v923_v18 = vld [vmem:[%s2613_s4 + $0x10] sm:$0xff]  ;;  %v932_v25 = vld [vmem:[%s2617_s8 + $0x28] sm:$0xff] }
  0x5a   : > { %v921_v15 = vld [vmem:[%s2613_s4] sm:$0xff] }
  0x5b   : > { %v804_v44 = vadd.f32 %v803_v40, %v737_v39  ;;  %v765_v45 = vadd.f32 %v764_v22, %v704_v27  ;;  %v925_v20 = vld [vmem:[%s2613_s4 + $0x20] sm:$0xff]  ;;  %v929_v22 = vld [vmem:[%s2617_s8 + $0x10] sm:$0xff] }
  0x5c   : > { %v931_v27 = vld [vmem:[%s2617_s8 + $0x20] sm:$0xff] }
  0x5d   : > { %v805_v59 = vadd.f32 %v804_v44, %v741_v4  ;;  %v766_v60 = vadd.f32 %v765_v45, %v708_v43  ;;  %v927_v56 = vld [vmem:[%s2617_s8] sm:$0xff] }
  0x5e   : > { %v997_v3 = vld [vmem:[%s2614_s5 + $0x20] sm:$0xff] }
  0x5f   : > { %v873_v30 = vadd.f32 %v869_v61, %v805_v59  ;;  %v767_v8 = vadd.f32 %v766_v60, %v712_v42  ;;  %v928_v42 = vld [vmem:[%s2617_s8 + $0x8] sm:$0xff] }
  0x61   : > { %906 = vmatpush.msra.mxu0 %v873_v30  ;;  %v768_v10 = vadd.f32 %v767_v8, %v716_v52  ;;  %v993_v8 = vld [vmem:[%s2614_s5] sm:$0xff] }
  0x63   : > { %v769_v55 = vadd.f32 %v768_v10, %v720_v54  ;;  %v996_v10 = vld [vmem:[%s2614_s5 + $0x18] sm:$0xff] }
  0x65   : > { %v770_v29 = vadd.f32 %v769_v55, %v724_v46  ;;  %v995_v46 = vld [vmem:[%s2614_s5 + $0x10] sm:$0xff] }
  0x66   : > { %v999_v55 = vld [vmem:[%s2614_s5 + $0x30] sm:$0xff] }
  0x67   : > { %v771_v57 = vadd.f32 %v770_v29, %v728_v47  ;;  %v998_v47 = vld [vmem:[%s2614_s5 + $0x28] sm:$0xff] }
  0x68   : > { %v1002_v29 = vld [vmem:[%s2614_s5 + $0x48] sm:$0xff] }
  0x69   : > { %v772_v36 = vadd.f32 %v771_v57, %v732_v28  ;;  %v1001_v28 = vld [vmem:[%s2614_s5 + $0x40] sm:$0xff] }
  0x6a   : > { %v1005_v57 = vld [vmem:[%s2614_s5 + $0x60] sm:$0xff] }
  0x6b   : > { %v773_v0 = vadd.f32 %v772_v36, %v736_v9  ;;  %v1004_v9 = vld [vmem:[%s2614_s5 + $0x58] sm:$0xff]  ;;  %v1007_v36 = vld [vmem:[%s2614_s5 + $0x70] sm:$0xff] }
  0x6d   : > { %v774_v48 = vadd.f32 %v773_v0, %v740_v63  ;;  %v1006_v63 = vld [vmem:[%s2614_s5 + $0x68] sm:$0xff]  ;;  %v1008_v0 = vld [vmem:[%s2614_s5 + $0x78] sm:$0xff] }
  0x6f   : > { %v872_v1 = vadd.f32 %v868_v31, %v774_v48 }
  0x71   : > { %907 = vmatpush.msra.mxu0 %v872_v1 }
  0x72   : > { %1403 = vmatmul.msk.f32.vlgmr.msra.gmra.mxu0 %vm882_vm0, %v876_v2 }
  0x7a   : > { %1404 = vmatmul.msk.f32.gmra.mxu0 %vm882_vm0, %v877_v49 }
  0x82   : > { %1405 = vmatmul.msk.f32.gmra.mxu0 %vm882_vm0, %v878_v6 }
  0xef   : > { %v909_v5 = vpop.f32.mrf.mxu0 }
  0xf0   : > { %v910_v21 = vadd.f32 %v909_v5, %v879_v17 }
  0xf2   : > { %v918_v26 = vmax.f32 %v910_v21, 0.0 }
  0xf7   : > { %v912_v41 = vpop.f32.mrf.mxu0 }
  0xf8   : > { %v913_v50 = vadd.f32 %v912_v41, %v880_v7 }
  0xfa   : > { %v919_v38 = vmax.f32 %v913_v50, 0.0 }
  0xff   : > { %v915_v13 = vpop.f32.mrf.mxu0 }
 0x100   : > { %v916_v33 = vadd.f32 %v915_v13, %v881_v62 }
 0x102   : > { %v920_v12 = vmax.f32 %v916_v33, 0.0 }
 0x104   : > { %965 = vmatpush.msra.mxu1 %v920_v12  ;;  %v1023_v12 = vld [vmem:[%s2618_s9 + $0x70] sm:$0xff] }
 0x106   : > { %966 = vmatpush.msra.mxu1 %v919_v38  ;;  %v1024_v38 = vld [vmem:[%s2618_s9 + $0x78] sm:$0xff] }
 0x108   : > { %967 = vmatpush.msra.mxu1 %v918_v26  ;;  %v1022_v26 = vld [vmem:[%s2618_s9 + $0x68] sm:$0xff] }
 0x109   : > { %1406 = vmatmul.msk.f32.vlgmr.msra.gmra.mxu1 %vm933_vm1, %v921_v15 }
 0x111   : > { %1407 = vmatmul.msk.f32.gmra.mxu1 %vm933_vm1, %v922_v16 }
 0x119   : > { %1408 = vmatmul.msk.f32.gmra.mxu1 %vm933_vm1, %v923_v18 }
 0x121   : > { %1409 = vmatmul.msk.f32.gmra.mxu1 %vm933_vm1, %v924_v19  ;;  %v1021_v19 = vld [vmem:[%s2618_s9 + $0x60] sm:$0xff] }
 0x129   : > { %1410 = vmatmul.msk.f32.gmra.mxu1 %vm933_vm1, %v925_v20 }
 0x131   : > { %1411 = vmatmul.msk.f32.gmra.mxu1 %vm933_vm1, %v926_v53 }
 0x186   : > { %v969_v51 = vpop.f32.mrf.mxu1 }
 0x187   : > { %v970_v60 = vadd.f32 %v969_v51, %v927_v56  ;;  %v1020_v51 = vld [vmem:[%s2618_s9 + $0x58] sm:$0xff] }
 0x189   : > { %v987_v54 = vmax.f32 %v970_v60, 0.0 }
 0x18e   : > { %v972_v14 = vpop.f32.mrf.mxu1 }
 0x18f   : > { %v973_v59 = vadd.f32 %v972_v14, %v928_v42 }
 0x191   : > { %v988_v30 = vmax.f32 %v973_v59, 0.0  ;;  %v1014_v59 = vld [vmem:[%s2618_s9 + $0x28] sm:$0xff] }
 0x196   : > { %v975_v58 = vpop.f32.mrf.mxu1 }
 0x197   : > { %v976_v45 = vadd.f32 %v975_v58, %v929_v22 }
 0x199   : > { %v989_v32 = vmax.f32 %v976_v45, 0.0  ;;  %v1015_v45 = vld [vmem:[%s2618_s9 + $0x30] sm:$0xff] }
 0x19e   : > { %v978_v39 = vpop.f32.mrf.mxu1 }
 0x19f   : > { %v979_v23 = vadd.f32 %v978_v39, %v930_v37  ;;  %v1019_v39 = vld [vmem:[%s2618_s9 + $0x50] sm:$0xff] }
 0x1a1   : > { %v990_v52 = vmax.f32 %v979_v23, 0.0  ;;  %v1016_v23 = vld [vmem:[%s2618_s9 + $0x38] sm:$0xff] }
 0x1a6   : > { %v981_v24 = vpop.f32.mrf.mxu1 }
 0x1a7   : > { %v982_v40 = vadd.f32 %v981_v24, %v931_v27 }
 0x1a9   : > { %v991_v61 = vmax.f32 %v982_v40, 0.0  ;;  %v1017_v40 = vld [vmem:[%s2618_s9 + $0x40] sm:$0xff] }
 0x1ae   : > { %v984_v4 = vpop.f32.mrf.mxu1 }
 0x1af   : > { %v985_v43 = vadd.f32 %v984_v4, %v932_v25  ;;  %v1018_v25 = vld [vmem:[%s2618_s9 + $0x48] sm:$0xff] }
 0x1b1   : > { %v992_v44 = vmax.f32 %v985_v43, 0.0 }
 0x1b3   : > { %1084 = vmatpush.msra.mxu2 %v992_v44 }
 0x1b5   : > { %1085 = vmatpush.msra.mxu2 %v991_v61 }
 0x1b7   : > { %1086 = vmatpush.msra.mxu2 %v990_v52 }
 0x1b9   : > { %1087 = vmatpush.msra.mxu2 %v989_v32  ;;  %v1013_v32 = vld [vmem:[%s2618_s9 + $0x20] sm:$0xff] }
 0x1bb   : > { %1088 = vmatpush.msra.mxu2 %v988_v30 }
 0x1bd   : > { %1089 = vmatpush.msra.mxu2 %v987_v54 }
 0x1be   : > { %1412 = vmatmul.msk.f32.vlgmr.msra.gmra.mxu2 %vm1025_vm2, %v993_v8  ;;  %v1012_v8 = vld [vmem:[%s2618_s9 + $0x18] sm:$0xff] }
 0x1c6   : > { %1413 = vmatmul.msk.f32.gmra.mxu2 %vm1025_vm2, %v994_v34 }
 0x1ce   : > { %1414 = vmatmul.msk.f32.gmra.mxu2 %vm1025_vm2, %v995_v46 }
 0x1d6   : > { %1415 = vmatmul.msk.f32.gmra.mxu2 %vm1025_vm2, %v996_v10  ;;  %v1011_v10 = vld [vmem:[%s2618_s9 + $0x10] sm:$0xff] }
 0x1de   : > { %1416 = vmatmul.msk.f32.gmra.mxu2 %vm1025_vm2, %v997_v3 }
 0x1e6   : > { %1417 = vmatmul.msk.f32.gmra.mxu2 %vm1025_vm2, %v998_v47 }
 0x1ee   : > { %1418 = vmatmul.msk.f32.gmra.mxu2 %vm1025_vm2, %v999_v55  ;;  %v1010_v55 = vld [vmem:[%s2618_s9 + $0x8] sm:$0xff] }
 0x1f6   : > { %1419 = vmatmul.msk.f32.gmra.mxu2 %vm1025_vm2, %v1000_v11 }
 0x1fe   : > { %1420 = vmatmul.msk.f32.gmra.mxu2 %vm1025_vm2, %v1001_v28 }
 0x206   : > { %1421 = vmatmul.msk.f32.gmra.mxu2 %vm1025_vm2, %v1002_v29  ;;  %v1009_v29 = vld [vmem:[%s2618_s9] sm:$0xff] }
 0x20e   : > { %1422 = vmatmul.msk.f32.gmra.mxu2 %vm1025_vm2, %v1003_v35 }
 0x216   : > { %1423 = vmatmul.msk.f32.gmra.mxu2 %vm1025_vm2, %v1004_v9 }
 0x21e   : > { %1424 = vmatmul.msk.f32.gmra.mxu2 %vm1025_vm2, %v1005_v57 }
 0x226   : > { %1425 = vmatmul.msk.f32.gmra.mxu2 %vm1025_vm2, %v1006_v63 }
 0x22e   : > { %1426 = vmatmul.msk.f32.gmra.mxu2 %vm1025_vm2, %v1007_v36 }
 0x236   : > { %1427 = vmatmul.msk.f32.gmra.mxu2 %vm1025_vm2, %v1008_v0 }
 0x241   : > { %v2369_v31 = vpop.f32.mrf.mxu2 }
 0x242   : > { %v1092_v57 = vadd.f32 %v2369_v31, %v1009_v29  ;;  %v1168_v31 = vld [vmem:[%s2615_s6 + $0x68] sm:$0xff] }
 0x244   : > { %v1139_v0 = vmax.f32 %v1092_v57, 0.0 }
 0x249   : > { %v2371_v48 = vpop.f32.mrf.mxu2 }
 0x24a   : > { %v1095_v35 = vadd.f32 %v2371_v48, %v1010_v55  ;;  %v1155_v48 = vld [vmem:[%s2615_s6] sm:$0xff] }
 0x24c   : > { %v1140_v36 = vmax.f32 %v1095_v35, 0.0  ;;  %v1196_v35 = vld [vmem:[%s2619_s10 + $0x88] sm:$0xff] }
 0x251   : > { %v2373_v1 = vpop.f32.mrf.mxu2 }
 0x252   : > { %v1098_v11 = vadd.f32 %v2373_v1, %v1011_v10  ;;  %v1156_v1 = vld [vmem:[%s2615_s6 + $0x8] sm:$0xff]  ;;  %v1183_v10 = vld [vmem:[%s2619_s10 + $0x20] sm:$0xff] }
 0x254   : > { %v1141_v63 = vmax.f32 %v1098_v11, 0.0 }
 0x259   : > { %v2375_v2 = vpop.f32.mrf.mxu2 }
 0x25a   : > { %v1101_v3 = vadd.f32 %v2375_v2, %v1012_v8  ;;  %v1169_v2 = vld [vmem:[%s2615_s6 + $0x70] sm:$0xff] }
 0x25c   : > { %v1142_v9 = vmax.f32 %v1101_v3, 0.0 }
 0x261   : > { %v2377_v49 = vpop.f32.mrf.mxu2 }
 0x262   : > { %v1104_v34 = vadd.f32 %v2377_v49, %v1013_v32  ;;  %v1157_v49 = vld [vmem:[%s2615_s6 + $0x10] sm:$0xff] }
 0x264   : > { %v1143_v28 = vmax.f32 %v1104_v34, 0.0 }
 0x269   : > { %v1106_v6 = vpop.f32.mrf.mxu2 }
 0x26a   : > { %v1107_v30 = vadd.f32 %v1106_v6, %v1014_v59  ;;  %v1170_v6 = vld [vmem:[%s2615_s6 + $0x78] sm:$0xff] }
 0x26b   : > { %v1194_v59 = vld [vmem:[%s2619_s10 + $0x78] sm:$0xff] }
 0x26c   : > { %v1144_v47 = vmax.f32 %v1107_v30, 0.0 }
 0x271   : > { %v1109_v5 = vpop.f32.mrf.mxu2 }
 0x272   : > { %v1110_v52 = vadd.f32 %v1109_v5, %v1015_v45  ;;  %v1158_v5 = vld [vmem:[%s2615_s6 + $0x18] sm:$0xff] }
 0x274   : > { %v1145_v46 = vmax.f32 %v1110_v52, 0.0  ;;  %v1182_v52 = vld [vmem:[%s2619_s10 + $0x18] sm:$0xff] }
 0x279   : > { %v1112_v41 = vpop.f32.mrf.mxu2 }
 0x27a   : > { %v1113_v61 = vadd.f32 %v1112_v41, %v1016_v23  ;;  %v1171_v41 = vld [vmem:[%s2615_s6 + $0x80] sm:$0xff] }
 0x27c   : > { %v1146_v54 = vmax.f32 %v1113_v61, 0.0 }
 0x281   : > { %v1115_v7 = vpop.f32.mrf.mxu2 }
 0x282   : > { %v1116_v44 = vadd.f32 %v1115_v7, %v1017_v40  ;;  %v1159_v7 = vld [vmem:[%s2615_s6 + $0x20] sm:$0xff] }
 0x284   : > { %v1147_v60 = vmax.f32 %v1116_v44, 0.0 }
 0x289   : > { %v1118_v62 = vpop.f32.mrf.mxu2 }
 0x28a   : > { %v1119_v43 = vadd.f32 %v1118_v62, %v1018_v25  ;;  %v1172_v62 = vld [vmem:[%s2615_s6 + $0x88] sm:$0xff] }
 0x28c   : > { %v1148_v56 = vmax.f32 %v1119_v43, 0.0  ;;  %v1193_v43 = vld [vmem:[%s2619_s10 + $0x70] sm:$0xff] }
 0x291   : > { %v1121_v17 = vpop.f32.mrf.mxu2 }
 0x292   : > { %v1122_v37 = vadd.f32 %v1121_v17, %v1019_v39  ;;  %v1165_v17 = vld [vmem:[%s2615_s6 + $0x50] sm:$0xff]  ;;  %v1192_v39 = vld [vmem:[%s2619_s10 + $0x68] sm:$0xff] }
 0x294   : > { %v1149_v42 = vmax.f32 %v1122_v37, 0.0 }
 0x299   : > { %v1124_v13 = vpop.f32.mrf.mxu2 }
 0x29a   : > { %v1125_v24 = vadd.f32 %v1124_v13, %v1020_v51  ;;  %v1160_v13 = vld [vmem:[%s2615_s6 + $0x28] sm:$0xff]  ;;  %v1179_v51 = vld [vmem:[%s2619_s10] sm:$0xff] }
 0x29c   : > { %v1150_v22 = vmax.f32 %v1125_v24, 0.0  ;;  %v1180_v24 = vld [vmem:[%s2619_s10 + $0x8] sm:$0xff] }
 0x2a1   : > { %v1127_v50 = vpop.f32.mrf.mxu2 }
 0x2a2   : > { %v1128_v14 = vadd.f32 %v1127_v50, %v1021_v19  ;;  %v1173_v50 = vld [vmem:[%s2615_s6 + $0x90] sm:$0xff]  ;;  %v1164_v19 = vld [vmem:[%s2615_s6 + $0x48] sm:$0xff] }
 0x2a4   : > { %v1151_v4 = vmax.f32 %v1128_v14, 0.0 }
 0x2a9   : > { %v1130_v33 = vpop.f32.mrf.mxu2 }
 0x2aa   : > { %v1131_v20 = vadd.f32 %v1130_v33, %v1022_v26  ;;  %v1166_v33 = vld [vmem:[%s2615_s6 + $0x58] sm:$0xff] }
 0x2ab   : > { %v1162_v26 = vld [vmem:[%s2615_s6 + $0x38] sm:$0xff] }
 0x2ac   : > { %v1152_v27 = vmax.f32 %v1131_v20, 0.0  ;;  %v1177_v20 = vld [vmem:[%s2615_s6 + $0xb0] sm:$0xff] }
 0x2b1   : > { %v1133_v21 = vpop.f32.mrf.mxu2 }
 0x2b2   : > { %v1134_v16 = vadd.f32 %v1133_v21, %v1023_v12  ;;  %v1161_v21 = vld [vmem:[%s2615_s6 + $0x30] sm:$0xff]  ;;  %v1174_v12 = vld [vmem:[%s2615_s6 + $0x98] sm:$0xff] }
 0x2b4   : > { %v1153_v58 = vmax.f32 %v1134_v16, 0.0  ;;  %v1163_v16 = vld [vmem:[%s2615_s6 + $0x40] sm:$0xff] }
 0x2b9   : > { %v1136_v15 = vpop.f32.mrf.mxu2 }
 0x2ba   : > { %v1137_v18 = vadd.f32 %v1136_v15, %v1024_v38  ;;  %v1167_v38 = vld [vmem:[%s2615_s6 + $0x60] sm:$0xff] }
 0x2bb   : > { %v1175_v15 = vld [vmem:[%s2615_s6 + $0xa0] sm:$0xff] }
 0x2bc   : > { %v1154_v53 = vmax.f32 %v1137_v18, 0.0  ;;  %v1176_v18 = vld [vmem:[%s2615_s6 + $0xa8] sm:$0xff] }
 0x2be   : > { %1203 = vmatpush.msrb.mxu0 %v1154_v53  ;;  %1430 = vmatpush.msrb.mxu1 %v1154_v53 }
 0x2bf   : > { %1431 = vmatpush.msra.mxu3 %v1154_v53  ;;  %v1178_v53 = vld [vmem:[%s2615_s6 + $0xb8] sm:$0xff] }
 0x2c0   : > { %1204 = vmatpush.msrb.mxu0 %v1153_v58  ;;  %1432 = vmatpush.msrb.mxu1 %v1153_v58 }
 0x2c1   : > { %1433 = vmatpush.msra.mxu3 %v1153_v58 }
 0x2c2   : > { %1205 = vmatpush.msrb.mxu0 %v1152_v27  ;;  %1434 = vmatpush.msrb.mxu1 %v1152_v27 }
 0x2c3   : > { %1435 = vmatpush.msra.mxu3 %v1152_v27 }
 0x2c4   : > { %1206 = vmatpush.msrb.mxu0 %v1151_v4  ;;  %1436 = vmatpush.msrb.mxu1 %v1151_v4 }
 0x2c5   : > { %1437 = vmatpush.msra.mxu3 %v1151_v4 }
 0x2c6   : > { %1207 = vmatpush.msrb.mxu0 %v1150_v22  ;;  %1438 = vmatpush.msrb.mxu1 %v1150_v22 }
 0x2c7   : > { %1439 = vmatpush.msra.mxu3 %v1150_v22  ;;  %v1181_v22 = vld [vmem:[%s2619_s10 + $0x10] sm:$0xff] }
 0x2c8   : > { %1208 = vmatpush.msrb.mxu0 %v1149_v42  ;;  %1440 = vmatpush.msrb.mxu1 %v1149_v42 }
 0x2c9   : > { %1441 = vmatpush.msra.mxu3 %v1149_v42 }
 0x2ca   : > { %1209 = vmatpush.msrb.mxu0 %v1148_v56  ;;  %1442 = vmatpush.msrb.mxu1 %v1148_v56 }
 0x2cb   : > { %1443 = vmatpush.msra.mxu3 %v1148_v56 }
 0x2cc   : > { %1210 = vmatpush.msrb.mxu0 %v1147_v60  ;;  %1444 = vmatpush.msrb.mxu1 %v1147_v60 }
 0x2cd   : > { %1445 = vmatpush.msra.mxu3 %v1147_v60 }
 0x2ce   : > { %1211 = vmatpush.msrb.mxu0 %v1146_v54  ;;  %1446 = vmatpush.msrb.mxu1 %v1146_v54 }
 0x2cf   : > { %1447 = vmatpush.msra.mxu3 %v1146_v54 }
 0x2d0   : > { %1212 = vmatpush.msrb.mxu0 %v1145_v46  ;;  %1448 = vmatpush.msrb.mxu1 %v1145_v46 }
 0x2d1   : > { %1449 = vmatpush.msra.mxu3 %v1145_v46  ;;  %v1195_v46 = vld [vmem:[%s2619_s10 + $0x80] sm:$0xff] }
 0x2d2   : > { %1213 = vmatpush.msrb.mxu0 %v1144_v47  ;;  %1450 = vmatpush.msrb.mxu1 %v1144_v47 }
 0x2d3   : > { %1451 = vmatpush.msra.mxu3 %v1144_v47 }
 0x2d4   : > { %1214 = vmatpush.msrb.mxu0 %v1143_v28  ;;  %1452 = vmatpush.msrb.mxu1 %v1143_v28 }
 0x2d5   : > { %1453 = vmatpush.msra.mxu3 %v1143_v28 }
 0x2d6   : > { %1215 = vmatpush.msrb.mxu0 %v1142_v9  ;;  %1454 = vmatpush.msrb.mxu1 %v1142_v9 }
 0x2d7   : > { %1455 = vmatpush.msra.mxu3 %v1142_v9  ;;  %v1184_v9 = vld [vmem:[%s2619_s10 + $0x28] sm:$0xff] }
 0x2d8   : > { %1216 = vmatpush.msrb.mxu0 %v1141_v63  ;;  %1456 = vmatpush.msrb.mxu1 %v1141_v63 }
 0x2d9   : > { %1457 = vmatpush.msra.mxu3 %v1141_v63  ;;  %v1189_v63 = vld [vmem:[%s2619_s10 + $0x50] sm:$0xff] }
 0x2da   : > { %1217 = vmatpush.msrb.mxu0 %v1140_v36  ;;  %1458 = vmatpush.msrb.mxu1 %v1140_v36 }
 0x2db   : > { %1459 = vmatpush.msra.mxu3 %v1140_v36 }
 0x2dc   : > { %1218 = vmatpush.msrb.mxu0 %v1139_v0  ;;  %1460 = vmatpush.msrb.mxu1 %v1139_v0 }
 0x2dd   : > { %1461 = vmatpush.msra.mxu3 %v1139_v0  ;;  %1219 = vmatmul.f32.vlgmr.msrb.gmra.mxu0 %v1155_v48 }
 0x2de   : > { %1258 = vmatmul.f32.vlgmr.msra.gmra.mxu3 %v1168_v31  ;;  %1249 = vmatmul.f32.vlgmr.msrb.gmra.mxu1 %v1165_v17 }
 0x2e5   : > { %1222 = vmatmul.f32.gmra.mxu0 %v1156_v1 }
 0x2e6   : > { %1261 = vmatmul.f32.gmra.mxu3 %v1169_v2  ;;  %1252 = vmatmul.f32.gmra.mxu1 %v1166_v33 }
 0x2ed   : > { %1225 = vmatmul.f32.gmra.mxu0 %v1157_v49 }
 0x2ee   : > { %1264 = vmatmul.f32.gmra.mxu3 %v1170_v6  ;;  %1255 = vmatmul.f32.gmra.mxu1 %v1167_v38  ;;  %v1197_v6 = vld [vmem:[%s2619_s10 + $0x90] sm:$0xff] }
 0x2f5   : > { %1228 = vmatmul.f32.gmra.mxu0 %v1158_v5  ;;  %v1185_v5 = vld [vmem:[%s2619_s10 + $0x30] sm:$0xff] }
 0x2f6   : > { %1267 = vmatmul.f32.gmra.mxu3 %v1171_v41 }
 0x2fd   : > { %1231 = vmatmul.f32.gmra.mxu0 %v1159_v7  ;;  %v1190_v7 = vld [vmem:[%s2619_s10 + $0x58] sm:$0xff] }
 0x2fe   : > { %1270 = vmatmul.f32.gmra.mxu3 %v1172_v62 }
 0x305   : > { %1234 = vmatmul.f32.gmra.mxu0 %v1160_v13 }
 0x306   : > { %1273 = vmatmul.f32.gmra.mxu3 %v1173_v50 }
 0x30d   : > { %1237 = vmatmul.f32.gmra.mxu0 %v1161_v21 }
 0x30e   : > { %1276 = vmatmul.f32.gmra.mxu3 %v1174_v12 }
 0x315   : > { %1240 = vmatmul.f32.gmra.mxu0 %v1162_v26  ;;  %v1198_v26 = vld [vmem:[%s2619_s10 + $0x98] sm:$0xff] }
 0x316   : > { %1279 = vmatmul.f32.gmra.mxu3 %v1175_v15  ;;  %v1186_v15 = vld [vmem:[%s2619_s10 + $0x38] sm:$0xff] }
 0x31d   : > { %1243 = vmatmul.f32.gmra.mxu0 %v1163_v16 }
 0x31e   : > { %1282 = vmatmul.f32.gmra.mxu3 %v1176_v18  ;;  %v1191_v18 = vld [vmem:[%s2619_s10 + $0x60] sm:$0xff] }
 0x325   : > { %1246 = vmatmul.f32.gmra.mxu0 %v1164_v19 }
 0x326   : > { %1285 = vmatmul.f32.gmra.mxu3 %v1177_v20 }
 0x32e   : > { %1288 = vmatmul.f32.gmra.mxu3 %v1178_v53 }
 0x35a   : > { %v1220_v14 = vpop.f32.mrf.mxu0 }
 0x35b   : > { %v1221_v58 = vadd.f32 %v1220_v14, %v1179_v51  ;;  %v1250_v36 = vpop.f32.mrf.mxu1 }
 0x35c   : > { %v1251_v1 = vadd.f32 %v1250_v36, %v1189_v63 }
 0x35d   : > { %1471 = vtanh.f32 %v1221_v58 }
 0x361   : > { %v1259_v27 = vpop.f32.mrf.mxu3 }
 0x362   : > { %v1260_v25 = vadd.f32 %v1259_v27, %v1192_v39  ;;  %v1223_v37 = vpop.f32.mrf.mxu0  ;;  %v1199_v27 = vld [vmem:[%s2619_s10 + $0xa0] sm:$0xff] }
 0x363   : > { %v1472_v4 = vpop.eup %1471  ;;  %v1224_v40 = vadd.f32 %v1223_v37, %v1180_v24  ;;  %v1253_v62 = vpop.f32.mrf.mxu1 }
 0x364   : > { %1473 = vtanh.f32 %v1260_v25  ;;  %1316 = vst [vmem:[%s2517_s22] sm:$0xff] %v1472_v4  ;;  %v1254_v33 = vadd.f32 %v1253_v62, %v1190_v7  ;;  %v1187_v25 = vld [vmem:[%s2619_s10 + $0x40] sm:$0xff] }
 0x365   : > { %1475 = vtanh.f32 %v1224_v40 }
 0x369   : > { %v1262_v23 = vpop.f32.mrf.mxu3 }
 0x36a   : > { %v1474_v44 = vpop.eup %1473  ;;  %v1263_v42 = vadd.f32 %v1262_v23, %v1193_v43  ;;  %v1226_v45 = vpop.f32.mrf.mxu0 }
 0x36b   : > { %v1476_v61 = vpop.eup %1475  ;;  %1329 = vst [vmem:[%s2517_s22 + $0x68] sm:$0xff] %v1474_v44  ;;  %v1227_v56 = vadd.f32 %v1226_v45, %v1181_v22  ;;  %v1256_v19 = vpop.f32.mrf.mxu1  ;;  %v1188_v45 = vld [vmem:[%s2619_s10 + $0x48] sm:$0xff] }
 0x36c   : > { %1477 = vtanh.f32 %v1263_v42  ;;  %1317 = vst [vmem:[%s2517_s22 + $0x8] sm:$0xff] %v1476_v61  ;;  %v1257_v14 = vadd.f32 %v1256_v19, %v1191_v18  ;;  %v1200_v42 = vld [vmem:[%s2619_s10 + $0xa8] sm:$0xff] }
 0x36d   : > { %1479 = vtanh.f32 %v1227_v56 }
 0x371   : > { %v1265_v60 = vpop.f32.mrf.mxu3 }
 0x372   : > { %v1478_v32 = vpop.eup %1477  ;;  %v1266_v30 = vadd.f32 %v1265_v60, %v1194_v59  ;;  %v1229_v54 = vpop.f32.mrf.mxu0 }
 0x373   : > { %v1480_v8 = vpop.eup %1479  ;;  %1330 = vst [vmem:[%s2517_s22 + $0x70] sm:$0xff] %v1478_v32  ;;  %v1230_v34 = vadd.f32 %v1229_v54, %v1182_v52 }
 0x374   : > { %1481 = vtanh.f32 %v1266_v30  ;;  %1318 = vst [vmem:[%s2517_s22 + $0x10] sm:$0xff] %v1480_v8  ;;  %v1201_v30 = vld [vmem:[%s2619_s10 + $0xb0] sm:$0xff] }
 0x375   : > { %1483 = vtanh.f32 %v1230_v34 }
 0x379   : > { %v1268_v3 = vpop.f32.mrf.mxu3 }
 0x37a   : > { %v1482_v47 = vpop.eup %1481  ;;  %v1269_v55 = vadd.f32 %v1268_v3, %v1195_v46  ;;  %v1232_v11 = vpop.f32.mrf.mxu0 }
 0x37b   : > { %v1484_v28 = vpop.eup %1483  ;;  %1331 = vst [vmem:[%s2517_s22 + $0x78] sm:$0xff] %v1482_v47  ;;  %v1233_v29 = vadd.f32 %v1232_v11, %v1183_v10  ;;  %v1202_v10 = vld [vmem:[%s2619_s10 + $0xb8] sm:$0xff] }
 0x37c   : > { %1485 = vtanh.f32 %v1269_v55  ;;  %1319 = vst [vmem:[%s2517_s22 + $0x18] sm:$0xff] %v1484_v28 }
 0x37d   : > { %1487 = vtanh.f32 %v1233_v29 }
 0x381   : > { %v1271_v57 = vpop.f32.mrf.mxu3 }
 0x382   : > { %v1486_v0 = vpop.eup %1485  ;;  %v1272_v48 = vadd.f32 %v1271_v57, %v1196_v35  ;;  %v1235_v31 = vpop.f32.mrf.mxu0 }
 0x383   : > { %v1488_v2 = vpop.eup %1487  ;;  %1332 = vst [vmem:[%s2517_s22 + $0x80] sm:$0xff] %v1486_v0  ;;  %v1236_v49 = vadd.f32 %v1235_v31, %v1184_v9 }
 0x384   : > { %1489 = vtanh.f32 %v1272_v48  ;;  %1320 = vst [vmem:[%s2517_s22 + $0x20] sm:$0xff] %v1488_v2 }
 0x385   : > { %1491 = vtanh.f32 %v1236_v49 }
 0x386   : > { %1493 = vtanh.f32 %v1251_v1 }
 0x389   : > { %v1274_v41 = vpop.f32.mrf.mxu3 }
 0x38a   : > { %v1490_v17 = vpop.eup %1489  ;;  %v1275_v13 = vadd.f32 %v1274_v41, %v1197_v6  ;;  %v1238_v50 = vpop.f32.mrf.mxu0 }
 0x38b   : > { %v1492_v21 = vpop.eup %1491  ;;  %1333 = vst [vmem:[%s2517_s22 + $0x88] sm:$0xff] %v1490_v17  ;;  %v1239_v12 = vadd.f32 %v1238_v50, %v1185_v5 }
 0x38c   : > { %v1494_v38 = vpop.eup %1493  ;;  %1495 = vtanh.f32 %v1275_v13  ;;  %1321 = vst [vmem:[%s2517_s22 + $0x28] sm:$0xff] %v1492_v21 }
 0x38d   : > { %1497 = vtanh.f32 %v1239_v12  ;;  %1326 = vst [vmem:[%s2517_s22 + $0x50] sm:$0xff] %v1494_v38 }
 0x38e   : > { %1499 = vtanh.f32 %v1254_v33 }
 0x391   : > { %v1277_v16 = vpop.f32.mrf.mxu3 }
 0x392   : > { %v1496_v20 = vpop.eup %1495  ;;  %v1278_v53 = vadd.f32 %v1277_v16, %v1198_v26  ;;  %v1241_v51 = vpop.f32.mrf.mxu0 }
 0x393   : > { %v1498_v58 = vpop.eup %1497  ;;  %1334 = vst [vmem:[%s2517_s22 + $0x90] sm:$0xff] %v1496_v20  ;;  %v1242_v39 = vadd.f32 %v1241_v51, %v1186_v15 }
 0x394   : > { %v1500_v24 = vpop.eup %1499  ;;  %1501 = vtanh.f32 %v1278_v53  ;;  %1322 = vst [vmem:[%s2517_s22 + $0x30] sm:$0xff] %v1498_v58 }
 0x395   : > { %1503 = vtanh.f32 %v1242_v39  ;;  %1327 = vst [vmem:[%s2517_s22 + $0x58] sm:$0xff] %v1500_v24 }
 0x396   : > { %1505 = vtanh.f32 %v1257_v14 }
 0x399   : > { %v1280_v37 = vpop.f32.mrf.mxu3 }
 0x39a   : > { %v1502_v4 = vpop.eup %1501  ;;  %v1281_v40 = vadd.f32 %v1280_v37, %v1199_v27  ;;  %v1244_v43 = vpop.f32.mrf.mxu0 }
 0x39b   : > { %v1504_v22 = vpop.eup %1503  ;;  %1335 = vst [vmem:[%s2517_s22 + $0x98] sm:$0xff] %v1502_v4  ;;  %v1245_v23 = vadd.f32 %v1244_v43, %v1187_v25 }
 0x39c   : > { %v1506_v44 = vpop.eup %1505  ;;  %1507 = vtanh.f32 %v1281_v40  ;;  %1323 = vst [vmem:[%s2517_s22 + $0x38] sm:$0xff] %v1504_v22 }
 0x39d   : > { %1509 = vtanh.f32 %v1245_v23  ;;  %1328 = vst [vmem:[%s2517_s22 + $0x60] sm:$0xff] %v1506_v44 }
 0x3a1   : > { %v1283_v61 = vpop.f32.mrf.mxu3 }
 0x3a2   : > { %v1508_v56 = vpop.eup %1507  ;;  %v1284_v59 = vadd.f32 %v1283_v61, %v1200_v42  ;;  %v1247_v52 = vpop.f32.mrf.mxu0 }
 0x3a3   : > { %v1510_v60 = vpop.eup %1509  ;;  %1336 = vst [vmem:[%s2517_s22 + $0xa0] sm:$0xff] %v1508_v56  ;;  %v1248_v32 = vadd.f32 %v1247_v52, %v1188_v45 }
 0x3a4   : > { %1511 = vtanh.f32 %v1284_v59  ;;  %1324 = vst [vmem:[%s2517_s22 + $0x40] sm:$0xff] %v1510_v60 }
 0x3a5   : > { %1513 = vtanh.f32 %v1248_v32 }
 0x3a9   : > { %v1286_v54 = vpop.f32.mrf.mxu3 }
 0x3aa   : > { %v1512_v8 = vpop.eup %1511  ;;  %v1287_v34 = vadd.f32 %v1286_v54, %v1201_v30 }
 0x3ab   : > { %v1514_v46 = vpop.eup %1513  ;;  %1337 = vst [vmem:[%s2517_s22 + $0xa8] sm:$0xff] %v1512_v8 }
 0x3ac   : > { %1515 = vtanh.f32 %v1287_v34  ;;  %1325 = vst [vmem:[%s2517_s22 + $0x48] sm:$0xff] %v1514_v46 }
 0x3b1   : > { %v1289_v3 = vpop.f32.mrf.mxu3 }
 0x3b2   : > { %v1516_v47 = vpop.eup %1515  ;;  %v1290_v55 = vadd.f32 %v1289_v3, %v1202_v10 }
 0x3b3   : > { %1338 = vst [vmem:[%s2517_s22 + $0xb0] sm:$0xff] %v1516_v47 }
 0x3b4   : > { %1517 = vtanh.f32 %v1290_v55 }
 0x3ba   : > { %v1518_v11 = vpop.eup %1517 }
 0x3bb   : > { %1339 = vst [vmem:[%s2517_s22 + $0xb8] sm:$0xff] %v1518_v11 }
 0x3bc PF: > { %s21_s17 = sadd.s32 1, %s1525_s17  }
 0x3bd   : > { %p18_p5 = scmp.ge.s32.totalorder %s21_s17, 6  }
 0x3bf   :  { %20 = sbr.rel (!%p18_p5) target bundleno = 1 (0x1), region = 94 }

</bundles_post_ra>
